<compile_context>
chip_gen: v7x
topology: tpu7x:2x2x1
jax: 0.10.0
libtpu: 0.0.40
codegen_flags: <defaults>
</compile_context>

<pallas_src>
import numpy as np

import jax
import jax.numpy as jnp
from jax import lax
from jax.experimental import pallas as pl
from jax.experimental.pallas import tpu as pltpu


# ----------------------------- constant builders -----------------------------

def _conv_out_size(size, k, stride, pad):
    return (size + 2 * pad - k) // stride + 1


def _make_shift_matrices(h, w, k, stride, pad):
    """S[t]: (h*w, oh*ow) 0/1 matrix implementing conv tap t=(ky,kx)'s zero-padded,
    strided spatial gather when applied on the right of a (rows, h*w) activation."""
    oh = _conv_out_size(h, k, stride, pad)
    ow = _conv_out_size(w, k, stride, pad)
    s = np.zeros((k * k, h * w, oh * ow), np.float32)
    for i in range(k):
        for j in range(k):
            t = i * k + j
            for oy in range(oh):
                iy = stride * oy + i - pad
                if iy < 0 or iy >= h:
                    continue
                for ox in range(ow):
                    ix = stride * ox + j - pad
                    if ix < 0 or ix >= w:
                        continue
                    s[t, iy * w + ix, oy * ow + ox] = 1.0
    return s, oh, ow


# -------------------------------- Pallas kernel --------------------------------

def _make_convnet_kernel(layer_meta):
    """Fused kernel: whole conv stack for ONE batch element (2-D activations only)."""

    def kernel(*refs):
        x_ref = refs[0]                 # (C0p, H0*W0)  bf16, NCHW-flattened input row-block
        out_ref = refs[-1]              # (C_last, OH*OW) f32

        act = x_ref[...]                # activation stays on-chip for all layers
        for li, meta in enumerate(layer_meta):
            s_ref = refs[1 + 3 * li]    # (HWin, k2*HWout)  bf16  concatenated shift matrices
            w_ref = refs[2 + 3 * li]    # (Cout, k2*Cin)    bf16  im2col weights
            b_ref = refs[3 + 3 * li]    # (Cout, 1)         f32   bias
            k2, hwout = meta["k2"], meta["hwout"]

            a16 = act.astype(jnp.bfloat16)
            # Gather (im2col) for ALL k^2 taps in ONE GEMM: (Cin,HWin)@(HWin,k2*HWout).
            g = jnp.dot(a16, s_ref[...], preferred_element_type=jnp.float32)
            # Stack the tap column-blocks along rows -> im2col matrix (k2*Cin, HWout).
            xcol = jnp.concatenate(
                [g[:, t * hwout:(t + 1) * hwout] for t in range(k2)], axis=0)
            # Channel mix for all taps in ONE GEMM, contraction depth k2*Cin.
            acc = jnp.dot(w_ref[...], xcol.astype(jnp.bfloat16),
                          preferred_element_type=jnp.float32)
            # f32 bias + ReLU epilogue on the VPU (v5e-friendly).
            act = jnp.maximum(acc + b_ref[...], 0.0)

        out_ref[...] = act              # single contiguous (C_last, OH*OW) store

    return kernel


# ------------------------------- params / init -------------------------------

def init_convnet_params(key, obs_shape, conv_sizes):
    h, w, c_in = obs_shape
    c_pad = -(-c_in // 8) * 8           # pad layer-0 input channels to a sublane multiple
    cin_pad0 = c_pad
    c_cur = c_in
    layers = []
    for (c_out, k, stride, pad) in conv_sizes:
        key, kw, kb = jax.random.split(key, 3)
        # PyTorch Conv2d layout (OIHW) for the reference weights.
        w_t = jax.random.normal(kw, (c_out, c_cur, k, k), jnp.float32) * 0.05
        b_t = jax.random.normal(kb, (c_out,), jnp.float32) * 0.05

        s_np, oh, ow = _make_shift_matrices(h, w, k, stride, pad)
        # (k*k, HWin, HWout) -> (HWin, k*k*HWout): tap blocks concatenated along columns.
        s_cat = jnp.asarray(
            s_np.transpose(1, 0, 2).reshape(h * w, k * k * oh * ow), jnp.bfloat16)

        # im2col weights (Cout, k*k*Cpad), column order (tap-major, channel-minor),
        # matching the row order produced by the in-kernel tap-block concatenation.
        w_np = np.zeros((c_out, c_pad, k, k), np.float32)
        w_np[:, :c_cur] = np.asarray(w_t)
        w_cat = jnp.asarray(
            w_np.transpose(0, 2, 3, 1).reshape(c_out, k * k * c_pad), jnp.bfloat16)
        b_col = jnp.asarray(np.asarray(b_t).reshape(c_out, 1), jnp.float32)

        layers.append(dict(torch_w=w_t, torch_b=b_t, s_cat=s_cat, w_cat=w_cat,
                           b_col=b_col, k2=k * k, hwin=h * w, hwout=oh * ow,
                           cin=c_pad, cout=c_out))

        h, w = oh, ow
        c_cur = c_out
        c_pad = c_out                   # 32 here; already a multiple of 8

    return dict(layers=layers, out_hw=(h, w), out_c=c_cur, cin_pad0=cin_pad0)


# ---------------------------------- wrapper ----------------------------------

def convnet_forward(params, states):
    """states: (B, H, W, C) NHWC, exactly like ConvNet.forward. Returns NCHW output."""
    b, h0, w0, c0 = states.shape
    layers = params["layers"]
    oh, ow = params["out_hw"]
    c_last = params["out_c"]
    c_pad0 = params["cin_pad0"]

    # The module's own states.permute(0, 3, 1, 2); zero-pad channels (zero weights on
    # the pad -> exact) and flatten spatial so the kernel is pure 2-D per batch element.
    x = jnp.transpose(states, (0, 3, 1, 2))
    if c_pad0 != c0:
        x = jnp.pad(x, ((0, 0), (0, c_pad0 - c0), (0, 0), (0, 0)))
    x3d = x.reshape(b, c_pad0, h0 * w0).astype(jnp.bfloat16)

    operands = [x3d]
    in_specs = [pl.BlockSpec((None, c_pad0, h0 * w0), lambda i: (i, 0, 0))]
    for lyr in layers:
        for name in ("s_cat", "w_cat", "b_col"):
            arr = lyr[name]
            operands.append(arr)
            # Full-array blocks, same block every grid step -> resident, loaded once.
            in_specs.append(pl.BlockSpec(arr.shape, lambda i: (0, 0)))

    out_spec = pl.BlockSpec((None, c_last, oh * ow), lambda i: (i, 0, 0))
    out_shape = jax.ShapeDtypeStruct((b, c_last, oh * ow), jnp.float32)

    # Honest, batch-linear cost estimate (no block-diag inflation).
    flops = 0
    for lyr in layers:
        flops += b * (2 * lyr["cin"] * lyr["hwin"] * lyr["k2"] * lyr["hwout"]    # gather
                      + 2 * lyr["cout"] * lyr["k2"] * lyr["cin"] * lyr["hwout"])  # mix
    const_bytes = sum(int(o.size) * o.dtype.itemsize for o in operands[1:])
    io_bytes = int(x3d.size) * x3d.dtype.itemsize + b * c_last * oh * ow * 4
    # Resident VMEM = constant operands + double-buffered per-step input/output blocks.
    resident = const_bytes + 2 * (c_pad0 * h0 * w0 * 2 + c_last * oh * ow * 4)
    vmem_limit = int(2 * resident + (16 << 20))   # headroom for intermediates/relayouts

    kernel = _make_convnet_kernel(
        [dict(k2=l["k2"], hwout=l["hwout"]) for l in layers])

    out3d = pl.pallas_call(
        kernel,
        grid=(b,),
        out_shape=out_shape,
        in_specs=in_specs,
        out_specs=out_spec,
        compiler_params=pltpu.CompilerParams(
            dimension_semantics=("parallel",),
            vmem_limit_bytes=vmem_limit),
        cost_estimate=pl.CostEstimate(flops=flops, transcendentals=0,
                                      bytes_accessed=const_bytes + io_bytes),
    )(*operands)

    # Metadata-only reshape: (B, C_last, OH*OW) -> (B, C_last, OH, OW) NCHW, like PyTorch.
    return out3d.reshape(b, c_last, oh, ow)


# ----------------------------- pure-JAX reference -----------------------------

def convnet_reference(params, states):
    x = jnp.transpose(states, (0, 3, 1, 2))
    for lyr in params["layers"]:
        k = int(np.sqrt(lyr["k2"]))
        stride_h = int(np.sqrt(lyr["hwin"])) // int(np.sqrt(lyr["hwout"]))
        del k, stride_h  # (strides/pads reconstructed below from stored torch params)
    x = jnp.transpose(states, (0, 3, 1, 2))
    for lyr, (c_out, k, stride, pad) in zip(params["layers"], params["conv_sizes"]):
        x = lax.conv_general_dilated(
            x, lyr["torch_w"],
            window_strides=(stride, stride),
            padding=[(pad, pad), (pad, pad)],
            dimension_numbers=("NCHW", "OIHW", "NCHW"),
            precision=lax.Precision.HIGHEST)
        x = jnp.maximum(x + lyr["torch_b"].reshape(1, -1, 1, 1), 0.0)
    return x


# ------------------------------------ main ------------------------------------

if __name__ == "__main__":
    obs_shape = (16, 16, 4)      # (H, W, C) — NHWC input, as ConvNet.forward expects
    conv_sizes = [(32, 3, 2, 1), (32, 3, 1, 1), (32, 3, 1, 1), (32, 3, 1, 1)]
    batch = 2

    key = jax.random.PRNGKey(0)
    key, k_states, k_params = jax.random.split(key, 3)
    states = jax.random.normal(k_states, (batch,) + obs_shape, jnp.float32)

    params = init_convnet_params(k_params, obs_shape, conv_sizes)
    params["conv_sizes"] = conv_sizes

    out = jax.block_until_ready(convnet_forward(params, states))

    oh, ow = params["out_hw"]
    assert out.shape == (batch, params["out_c"], oh, ow)       # (2, 32, 8, 8) NCHW

    ref = jax.block_until_ready(convnet_reference(params, states))
    max_err = float(jnp.max(jnp.abs(out - ref)))
    # bf16 MXU operands (f32 accumulation) vs f32-HIGHEST XLA reference: ~1e-2 worst case.
    assert max_err < 3e-2, f"Pallas ConvNet mismatch vs XLA conv reference: {max_err}"

    print("KERNEL_OK")
</pallas_src>

<mosaic_0001>
module attributes {stable_mosaic.version = 11 : i64} {
  func.func @kernel(%arg0: i32, %arg1: memref<1x8x256xbf16, #tpu.memory_space<vmem>>, %arg2: memref<256x576xbf16, #tpu.memory_space<vmem>>, %arg3: memref<32x72xbf16, #tpu.memory_space<vmem>>, %arg4: memref<32x1xf32, #tpu.memory_space<vmem>>, %arg5: memref<64x576xbf16, #tpu.memory_space<vmem>>, %arg6: memref<32x288xbf16, #tpu.memory_space<vmem>>, %arg7: memref<32x1xf32, #tpu.memory_space<vmem>>, %arg8: memref<64x576xbf16, #tpu.memory_space<vmem>>, %arg9: memref<32x288xbf16, #tpu.memory_space<vmem>>, %arg10: memref<32x1xf32, #tpu.memory_space<vmem>>, %arg11: memref<64x576xbf16, #tpu.memory_space<vmem>>, %arg12: memref<32x288xbf16, #tpu.memory_space<vmem>>, %arg13: memref<32x1xf32, #tpu.memory_space<vmem>>, %arg14: memref<1x32x64xf32, #tpu.memory_space<vmem>>) attributes {dimension_semantics = [#tpu.dimension_semantics<parallel>], iteration_bounds = array<i64: 2>, scalar_prefetch = 0 : i64, scratch_operands = 0 : i64, tpu.core_type = #tpu.core_type<tc>, window_params = [{transform_indices = @transform_0, window_bounds = array<i64: 1, 8, 256>}, {pipeline_mode = #tpu.pipeline_mode<synchronous>, transform_indices = @transform_1, window_bounds = array<i64: 256, 576>}, {pipeline_mode = #tpu.pipeline_mode<synchronous>, transform_indices = @transform_2, window_bounds = array<i64: 32, 72>}, {pipeline_mode = #tpu.pipeline_mode<synchronous>, transform_indices = @transform_3, window_bounds = array<i64: 32, 1>}, {pipeline_mode = #tpu.pipeline_mode<synchronous>, transform_indices = @transform_4, window_bounds = array<i64: 64, 576>}, {pipeline_mode = #tpu.pipeline_mode<synchronous>, transform_indices = @transform_5, window_bounds = array<i64: 32, 288>}, {pipeline_mode = #tpu.pipeline_mode<synchronous>, transform_indices = @transform_6, window_bounds = array<i64: 32, 1>}, {pipeline_mode = #tpu.pipeline_mode<synchronous>, transform_indices = @transform_7, window_bounds = array<i64: 64, 576>}, {pipeline_mode = #tpu.pipeline_mode<synchronous>, transform_indices = @transform_8, window_bounds = array<i64: 32, 288>}, {pipeline_mode = #tpu.pipeline_mode<synchronous>, transform_indices = @transform_9, window_bounds = array<i64: 32, 1>}, {pipeline_mode = #tpu.pipeline_mode<synchronous>, transform_indices = @transform_10, window_bounds = array<i64: 64, 576>}, {pipeline_mode = #tpu.pipeline_mode<synchronous>, transform_indices = @transform_11, window_bounds = array<i64: 32, 288>}, {pipeline_mode = #tpu.pipeline_mode<synchronous>, transform_indices = @transform_12, window_bounds = array<i64: 32, 1>}, {transform_indices = @transform_13, window_bounds = array<i64: 1, 32, 64>}]} {
    %c0 = arith.constant 0 : index
    %c0_0 = arith.constant 0 : index
    %c0_1 = arith.constant 0 : index
    %0 = vector.load %arg1[%c0, %c0_0, %c0_1] : memref<1x8x256xbf16, #tpu.memory_space<vmem>>, vector<1x8x256xbf16>
    %1 = vector.shape_cast %0 : vector<1x8x256xbf16> to vector<8x256xbf16>
    %c0_2 = arith.constant 0 : index
    %c0_3 = arith.constant 0 : index
    %2 = vector.load %arg2[%c0_2, %c0_3] : memref<256x576xbf16, #tpu.memory_space<vmem>>, vector<256x576xbf16>
    %cst = arith.constant dense<0.000000e+00> : vector<8x576xf32>
    %3 = tpu.matmul %1, %2, %cst {dimension_numbers = #tpu.dot_dimension_numbers<[1], [0], [0], [1], [0, 0, 1, 1], [], []>} : vector<8x256xbf16>, vector<256x576xbf16>, vector<8x576xf32> -> vector<8x576xf32>
    %4 = vector.extract_strided_slice %3 {offsets = [0, 0], sizes = [8, 64], strides = [1, 1]} : vector<8x576xf32> to vector<8x64xf32>
    %5 = vector.extract_strided_slice %3 {offsets = [0, 64], sizes = [8, 64], strides = [1, 1]} : vector<8x576xf32> to vector<8x64xf32>
    %6 = vector.extract_strided_slice %3 {offsets = [0, 128], sizes = [8, 64], strides = [1, 1]} : vector<8x576xf32> to vector<8x64xf32>
    %7 = vector.extract_strided_slice %3 {offsets = [0, 192], sizes = [8, 64], strides = [1, 1]} : vector<8x576xf32> to vector<8x64xf32>
    %8 = vector.extract_strided_slice %3 {offsets = [0, 256], sizes = [8, 64], strides = [1, 1]} : vector<8x576xf32> to vector<8x64xf32>
    %9 = vector.extract_strided_slice %3 {offsets = [0, 320], sizes = [8, 64], strides = [1, 1]} : vector<8x576xf32> to vector<8x64xf32>
    %10 = vector.extract_strided_slice %3 {offsets = [0, 384], sizes = [8, 64], strides = [1, 1]} : vector<8x576xf32> to vector<8x64xf32>
    %11 = vector.extract_strided_slice %3 {offsets = [0, 448], sizes = [8, 64], strides = [1, 1]} : vector<8x576xf32> to vector<8x64xf32>
    %12 = vector.extract_strided_slice %3 {offsets = [0, 512], sizes = [8, 64], strides = [1, 1]} : vector<8x576xf32> to vector<8x64xf32>
    %13 = tpu.concatenate %4, %5, %6, %7, %8, %9, %10, %11, %12 in 0 : vector<8x64xf32>, vector<8x64xf32>, vector<8x64xf32>, vector<8x64xf32>, vector<8x64xf32>, vector<8x64xf32>, vector<8x64xf32>, vector<8x64xf32>, vector<8x64xf32> -> vector<72x64xf32>
    %c0_4 = arith.constant 0 : index
    %c0_5 = arith.constant 0 : index
    %14 = vector.load %arg3[%c0_4, %c0_5] : memref<32x72xbf16, #tpu.memory_space<vmem>>, vector<32x72xbf16>
    %15 = arith.truncf %13 : vector<72x64xf32> to vector<72x64xbf16>
    %cst_6 = arith.constant dense<0.000000e+00> : vector<32x64xf32>
    %16 = tpu.matmul %14, %15, %cst_6 {dimension_numbers = #tpu.dot_dimension_numbers<[1], [0], [0], [1], [0, 0, 1, 1], [], []>} : vector<32x72xbf16>, vector<72x64xbf16>, vector<32x64xf32> -> vector<32x64xf32>
    %c0_7 = arith.constant 0 : index
    %c0_8 = arith.constant 0 : index
    %17 = vector.load %arg4[%c0_7, %c0_8] : memref<32x1xf32, #tpu.memory_space<vmem>>, vector<32x1xf32>
    %18 = vector.broadcast %17 : vector<32x1xf32> to vector<32x64xf32>
    %19 = arith.addf %16, %18 : vector<32x64xf32>
    %cst_9 = arith.constant 0.000000e+00 : f32
    %20 = vector.broadcast %cst_9 : f32 to vector<32x64xf32>
    %21 = arith.maximumf %19, %20 : vector<32x64xf32>
    %22 = arith.truncf %21 : vector<32x64xf32> to vector<32x64xbf16>
    %c0_10 = arith.constant 0 : index
    %c0_11 = arith.constant 0 : index
    %23 = vector.load %arg5[%c0_10, %c0_11] : memref<64x576xbf16, #tpu.memory_space<vmem>>, vector<64x576xbf16>
    %cst_12 = arith.constant dense<0.000000e+00> : vector<32x576xf32>
    %24 = tpu.matmul %22, %23, %cst_12 {dimension_numbers = #tpu.dot_dimension_numbers<[1], [0], [0], [1], [0, 0, 1, 1], [], []>} : vector<32x64xbf16>, vector<64x576xbf16>, vector<32x576xf32> -> vector<32x576xf32>
    %25 = vector.extract_strided_slice %24 {offsets = [0, 0], sizes = [32, 64], strides = [1, 1]} : vector<32x576xf32> to vector<32x64xf32>
    %26 = vector.extract_strided_slice %24 {offsets = [0, 64], sizes = [32, 64], strides = [1, 1]} : vector<32x576xf32> to vector<32x64xf32>
    %27 = vector.extract_strided_slice %24 {offsets = [0, 128], sizes = [32, 64], strides = [1, 1]} : vector<32x576xf32> to vector<32x64xf32>
    %28 = vector.extract_strided_slice %24 {offsets = [0, 192], sizes = [32, 64], strides = [1, 1]} : vector<32x576xf32> to vector<32x64xf32>
    %29 = vector.extract_strided_slice %24 {offsets = [0, 256], sizes = [32, 64], strides = [1, 1]} : vector<32x576xf32> to vector<32x64xf32>
    %30 = vector.extract_strided_slice %24 {offsets = [0, 320], sizes = [32, 64], strides = [1, 1]} : vector<32x576xf32> to vector<32x64xf32>
    %31 = vector.extract_strided_slice %24 {offsets = [0, 384], sizes = [32, 64], strides = [1, 1]} : vector<32x576xf32> to vector<32x64xf32>
    %32 = vector.extract_strided_slice %24 {offsets = [0, 448], sizes = [32, 64], strides = [1, 1]} : vector<32x576xf32> to vector<32x64xf32>
    %33 = vector.extract_strided_slice %24 {offsets = [0, 512], sizes = [32, 64], strides = [1, 1]} : vector<32x576xf32> to vector<32x64xf32>
    %34 = tpu.concatenate %25, %26, %27, %28, %29, %30, %31, %32, %33 in 0 : vector<32x64xf32>, vector<32x64xf32>, vector<32x64xf32>, vector<32x64xf32>, vector<32x64xf32>, vector<32x64xf32>, vector<32x64xf32>, vector<32x64xf32>, vector<32x64xf32> -> vector<288x64xf32>
    %c0_13 = arith.constant 0 : index
    %c0_14 = arith.constant 0 : index
    %35 = vector.load %arg6[%c0_13, %c0_14] : memref<32x288xbf16, #tpu.memory_space<vmem>>, vector<32x288xbf16>
    %36 = arith.truncf %34 : vector<288x64xf32> to vector<288x64xbf16>
    %cst_15 = arith.constant dense<0.000000e+00> : vector<32x64xf32>
    %37 = tpu.matmul %35, %36, %cst_15 {dimension_numbers = #tpu.dot_dimension_numbers<[1], [0], [0], [1], [0, 0, 1, 1], [], []>} : vector<32x288xbf16>, vector<288x64xbf16>, vector<32x64xf32> -> vector<32x64xf32>
    %c0_16 = arith.constant 0 : index
    %c0_17 = arith.constant 0 : index
    %38 = vector.load %arg7[%c0_16, %c0_17] : memref<32x1xf32, #tpu.memory_space<vmem>>, vector<32x1xf32>
    %39 = vector.broadcast %38 : vector<32x1xf32> to vector<32x64xf32>
    %40 = arith.addf %37, %39 : vector<32x64xf32>
    %cst_18 = arith.constant 0.000000e+00 : f32
    %41 = vector.broadcast %cst_18 : f32 to vector<32x64xf32>
    %42 = arith.maximumf %40, %41 : vector<32x64xf32>
    %43 = arith.truncf %42 : vector<32x64xf32> to vector<32x64xbf16>
    %c0_19 = arith.constant 0 : index
    %c0_20 = arith.constant 0 : index
    %44 = vector.load %arg8[%c0_19, %c0_20] : memref<64x576xbf16, #tpu.memory_space<vmem>>, vector<64x576xbf16>
    %cst_21 = arith.constant dense<0.000000e+00> : vector<32x576xf32>
    %45 = tpu.matmul %43, %44, %cst_21 {dimension_numbers = #tpu.dot_dimension_numbers<[1], [0], [0], [1], [0, 0, 1, 1], [], []>} : vector<32x64xbf16>, vector<64x576xbf16>, vector<32x576xf32> -> vector<32x576xf32>
    %46 = vector.extract_strided_slice %45 {offsets = [0, 0], sizes = [32, 64], strides = [1, 1]} : vector<32x576xf32> to vector<32x64xf32>
    %47 = vector.extract_strided_slice %45 {offsets = [0, 64], sizes = [32, 64], strides = [1, 1]} : vector<32x576xf32> to vector<32x64xf32>
    %48 = vector.extract_strided_slice %45 {offsets = [0, 128], sizes = [32, 64], strides = [1, 1]} : vector<32x576xf32> to vector<32x64xf32>
    %49 = vector.extract_strided_slice %45 {offsets = [0, 192], sizes = [32, 64], strides = [1, 1]} : vector<32x576xf32> to vector<32x64xf32>
    %50 = vector.extract_strided_slice %45 {offsets = [0, 256], sizes = [32, 64], strides = [1, 1]} : vector<32x576xf32> to vector<32x64xf32>
    %51 = vector.extract_strided_slice %45 {offsets = [0, 320], sizes = [32, 64], strides = [1, 1]} : vector<32x576xf32> to vector<32x64xf32>
    %52 = vector.extract_strided_slice %45 {offsets = [0, 384], sizes = [32, 64], strides = [1, 1]} : vector<32x576xf32> to vector<32x64xf32>
    %53 = vector.extract_strided_slice %45 {offsets = [0, 448], sizes = [32, 64], strides = [1, 1]} : vector<32x576xf32> to vector<32x64xf32>
    %54 = vector.extract_strided_slice %45 {offsets = [0, 512], sizes = [32, 64], strides = [1, 1]} : vector<32x576xf32> to vector<32x64xf32>
    %55 = tpu.concatenate %46, %47, %48, %49, %50, %51, %52, %53, %54 in 0 : vector<32x64xf32>, vector<32x64xf32>, vector<32x64xf32>, vector<32x64xf32>, vector<32x64xf32>, vector<32x64xf32>, vector<32x64xf32>, vector<32x64xf32>, vector<32x64xf32> -> vector<288x64xf32>
    %c0_22 = arith.constant 0 : index
    %c0_23 = arith.constant 0 : index
    %56 = vector.load %arg9[%c0_22, %c0_23] : memref<32x288xbf16, #tpu.memory_space<vmem>>, vector<32x288xbf16>
    %57 = arith.truncf %55 : vector<288x64xf32> to vector<288x64xbf16>
    %cst_24 = arith.constant dense<0.000000e+00> : vector<32x64xf32>
    %58 = tpu.matmul %56, %57, %cst_24 {dimension_numbers = #tpu.dot_dimension_numbers<[1], [0], [0], [1], [0, 0, 1, 1], [], []>} : vector<32x288xbf16>, vector<288x64xbf16>, vector<32x64xf32> -> vector<32x64xf32>
    %c0_25 = arith.constant 0 : index
    %c0_26 = arith.constant 0 : index
    %59 = vector.load %arg10[%c0_25, %c0_26] : memref<32x1xf32, #tpu.memory_space<vmem>>, vector<32x1xf32>
    %60 = vector.broadcast %59 : vector<32x1xf32> to vector<32x64xf32>
    %61 = arith.addf %58, %60 : vector<32x64xf32>
    %cst_27 = arith.constant 0.000000e+00 : f32
    %62 = vector.broadcast %cst_27 : f32 to vector<32x64xf32>
    %63 = arith.maximumf %61, %62 : vector<32x64xf32>
    %64 = arith.truncf %63 : vector<32x64xf32> to vector<32x64xbf16>
    %c0_28 = arith.constant 0 : index
    %c0_29 = arith.constant 0 : index
    %65 = vector.load %arg11[%c0_28, %c0_29] : memref<64x576xbf16, #tpu.memory_space<vmem>>, vector<64x576xbf16>
    %cst_30 = arith.constant dense<0.000000e+00> : vector<32x576xf32>
    %66 = tpu.matmul %64, %65, %cst_30 {dimension_numbers = #tpu.dot_dimension_numbers<[1], [0], [0], [1], [0, 0, 1, 1], [], []>} : vector<32x64xbf16>, vector<64x576xbf16>, vector<32x576xf32> -> vector<32x576xf32>
    %67 = vector.extract_strided_slice %66 {offsets = [0, 0], sizes = [32, 64], strides = [1, 1]} : vector<32x576xf32> to vector<32x64xf32>
    %68 = vector.extract_strided_slice %66 {offsets = [0, 64], sizes = [32, 64], strides = [1, 1]} : vector<32x576xf32> to vector<32x64xf32>
    %69 = vector.extract_strided_slice %66 {offsets = [0, 128], sizes = [32, 64], strides = [1, 1]} : vector<32x576xf32> to vector<32x64xf32>
    %70 = vector.extract_strided_slice %66 {offsets = [0, 192], sizes = [32, 64], strides = [1, 1]} : vector<32x576xf32> to vector<32x64xf32>
    %71 = vector.extract_strided_slice %66 {offsets = [0, 256], sizes = [32, 64], strides = [1, 1]} : vector<32x576xf32> to vector<32x64xf32>
    %72 = vector.extract_strided_slice %66 {offsets = [0, 320], sizes = [32, 64], strides = [1, 1]} : vector<32x576xf32> to vector<32x64xf32>
    %73 = vector.extract_strided_slice %66 {offsets = [0, 384], sizes = [32, 64], strides = [1, 1]} : vector<32x576xf32> to vector<32x64xf32>
    %74 = vector.extract_strided_slice %66 {offsets = [0, 448], sizes = [32, 64], strides = [1, 1]} : vector<32x576xf32> to vector<32x64xf32>
    %75 = vector.extract_strided_slice %66 {offsets = [0, 512], sizes = [32, 64], strides = [1, 1]} : vector<32x576xf32> to vector<32x64xf32>
    %76 = tpu.concatenate %67, %68, %69, %70, %71, %72, %73, %74, %75 in 0 : vector<32x64xf32>, vector<32x64xf32>, vector<32x64xf32>, vector<32x64xf32>, vector<32x64xf32>, vector<32x64xf32>, vector<32x64xf32>, vector<32x64xf32>, vector<32x64xf32> -> vector<288x64xf32>
    %c0_31 = arith.constant 0 : index
    %c0_32 = arith.constant 0 : index
    %77 = vector.load %arg12[%c0_31, %c0_32] : memref<32x288xbf16, #tpu.memory_space<vmem>>, vector<32x288xbf16>
    %78 = arith.truncf %76 : vector<288x64xf32> to vector<288x64xbf16>
    %cst_33 = arith.constant dense<0.000000e+00> : vector<32x64xf32>
    %79 = tpu.matmul %77, %78, %cst_33 {dimension_numbers = #tpu.dot_dimension_numbers<[1], [0], [0], [1], [0, 0, 1, 1], [], []>} : vector<32x288xbf16>, vector<288x64xbf16>, vector<32x64xf32> -> vector<32x64xf32>
    %c0_34 = arith.constant 0 : index
    %c0_35 = arith.constant 0 : index
    %80 = vector.load %arg13[%c0_34, %c0_35] : memref<32x1xf32, #tpu.memory_space<vmem>>, vector<32x1xf32>
    %81 = vector.broadcast %80 : vector<32x1xf32> to vector<32x64xf32>
    %82 = arith.addf %79, %81 : vector<32x64xf32>
    %cst_36 = arith.constant 0.000000e+00 : f32
    %83 = vector.broadcast %cst_36 : f32 to vector<32x64xf32>
    %84 = arith.maximumf %82, %83 : vector<32x64xf32>
    %c0_37 = arith.constant 0 : index
    %c0_38 = arith.constant 0 : index
    %c0_39 = arith.constant 0 : index
    %85 = vector.load %arg14[%c0_37, %c0_38, %c0_39] : memref<1x32x64xf32, #tpu.memory_space<vmem>>, vector<1x32x64xf32>
    %86 = vector.shape_cast %85 : vector<1x32x64xf32> to vector<32x64xf32>
    %87 = vector.shape_cast %84 : vector<32x64xf32> to vector<1x32x64xf32>
    tpu.vector_store %arg14[%c0_37, %c0_38, %c0_39], %87 {strides = array<i32>} : memref<1x32x64xf32, #tpu.memory_space<vmem>>, vector<1x32x64xf32>,
    return
  }
  func.func @transform_0(%arg0: i32) -> (i32, i32, i32) {
    %c0_i32 = arith.constant 0 : i32
    %c0_i32_0 = arith.constant 0 : i32
    %c0_i32_1 = arith.constant 0 : i32
    return %arg0, %c0_i32, %c0_i32_0 : i32, i32, i32
  }
  func.func @transform_1(%arg0: i32) -> (i32, i32) {
    %c0_i32 = arith.constant 0 : i32
    %c0_i32_0 = arith.constant 0 : i32
    %c0_i32_1 = arith.constant 0 : i32
    return %c0_i32, %c0_i32_0 : i32, i32
  }
  func.func @transform_2(%arg0: i32) -> (i32, i32) {
    %c0_i32 = arith.constant 0 : i32
    %c0_i32_0 = arith.constant 0 : i32
    %c0_i32_1 = arith.constant 0 : i32
    return %c0_i32, %c0_i32_0 : i32, i32
  }
  func.func @transform_3(%arg0: i32) -> (i32, i32) {
    %c0_i32 = arith.constant 0 : i32
    %c0_i32_0 = arith.constant 0 : i32
    %c0_i32_1 = arith.constant 0 : i32
    return %c0_i32, %c0_i32_0 : i32, i32
  }
  func.func @transform_4(%arg0: i32) -> (i32, i32) {
    %c0_i32 = arith.constant 0 : i32
    %c0_i32_0 = arith.constant 0 : i32
    %c0_i32_1 = arith.constant 0 : i32
    return %c0_i32, %c0_i32_0 : i32, i32
  }
  func.func @transform_5(%arg0: i32) -> (i32, i32) {
    %c0_i32 = arith.constant 0 : i32
    %c0_i32_0 = arith.constant 0 : i32
    %c0_i32_1 = arith.constant 0 : i32
    return %c0_i32, %c0_i32_0 : i32, i32
  }
  func.func @transform_6(%arg0: i32) -> (i32, i32) {
    %c0_i32 = arith.constant 0 : i32
    %c0_i32_0 = arith.constant 0 : i32
    %c0_i32_1 = arith.constant 0 : i32
    return %c0_i32, %c0_i32_0 : i32, i32
  }
  func.func @transform_7(%arg0: i32) -> (i32, i32) {
    %c0_i32 = arith.constant 0 : i32
    %c0_i32_0 = arith.constant 0 : i32
    %c0_i32_1 = arith.constant 0 : i32
    return %c0_i32, %c0_i32_0 : i32, i32
  }
  func.func @transform_8(%arg0: i32) -> (i32, i32) {
    %c0_i32 = arith.constant 0 : i32
    %c0_i32_0 = arith.constant 0 : i32
    %c0_i32_1 = arith.constant 0 : i32
    return %c0_i32, %c0_i32_0 : i32, i32
  }
  func.func @transform_9(%arg0: i32) -> (i32, i32) {
    %c0_i32 = arith.constant 0 : i32
    %c0_i32_0 = arith.constant 0 : i32
    %c0_i32_1 = arith.constant 0 : i32
    return %c0_i32, %c0_i32_0 : i32, i32
  }
  func.func @transform_10(%arg0: i32) -> (i32, i32) {
    %c0_i32 = arith.constant 0 : i32
    %c0_i32_0 = arith.constant 0 : i32
    %c0_i32_1 = arith.constant 0 : i32
    return %c0_i32, %c0_i32_0 : i32, i32
  }
  func.func @transform_11(%arg0: i32) -> (i32, i32) {
    %c0_i32 = arith.constant 0 : i32
    %c0_i32_0 = arith.constant 0 : i32
    %c0_i32_1 = arith.constant 0 : i32
    return %c0_i32, %c0_i32_0 : i32, i32
  }
  func.func @transform_12(%arg0: i32) -> (i32, i32) {
    %c0_i32 = arith.constant 0 : i32
    %c0_i32_0 = arith.constant 0 : i32
    %c0_i32_1 = arith.constant 0 : i32
    return %c0_i32, %c0_i32_0 : i32, i32
  }
  func.func @transform_13(%arg0: i32) -> (i32, i32, i32) {
    %c0_i32 = arith.constant 0 : i32
    %c0_i32_0 = arith.constant 0 : i32
    %c0_i32_1 = arith.constant 0 : i32
    return %arg0, %c0_i32, %c0_i32_0 : i32, i32, i32
  }
}

</mosaic_0001>

<bundles_post_ra>
// kernel: tpu_custom_call.1
= control target key start
LH: loop header
LB: loop body
LE: loop exit
PB: predicated region body
PF: predicated region fallthrough
CT: control target
= control target key end

     0   :  { %18 = vsyncpa [#allocation3], 0  ;;  %s4656_s0 = inlined_call_operand.vmem [shape: bf16[2,8,256], index: 0, kind: input, shape index: {}]   ;;  %s4657_s1 = inlined_call_operand.vmem [shape: bf16[256,576], index: 1, kind: input, shape index: {}]   ;;  %s4658_s2 = inlined_call_operand.vmem [shape: bf16[32,72], index: 2, kind: input, shape index: {}]   ;;  %s4659_s3 = inlined_call_operand.vmem [shape: f32[32,1], index: 3, kind: input, shape index: {}]   ;;  %s4660_s4 = inlined_call_operand.vmem [shape: bf16[64,576], index: 4, kind: input, shape index: {}]   ;;  %s4661_s5 = inlined_call_operand.vmem [shape: bf16[32,288], index: 5, kind: input, shape index: {}]   ;;  %s4662_s6 = inlined_call_operand.vmem [shape: f32[32,1], index: 6, kind: input, shape index: {}]   ;;  %s4663_s7 = inlined_call_operand.vmem [shape: bf16[64,576], index: 7, kind: input, shape index: {}]   ;;  %s4664_s8 = inlined_call_operand.vmem [shape: bf16[32,288], index: 8, kind: input, shape index: {}]   ;;  %s4665_s9 = inlined_call_operand.vmem [shape: f32[32,1], index: 9, kind: input, shape index: {}]   ;;  %s4666_s10 = inlined_call_operand.vmem [shape: bf16[64,576], index: 10, kind: input, shape index: {}]   ;;  %s4667_s11 = inlined_call_operand.vmem [shape: bf16[32,288], index: 11, kind: input, shape index: {}]   ;;  %s4668_s12 = inlined_call_operand.vmem [shape: f32[32,1], index: 12, kind: input, shape index: {}]   ;;  %s4669_s13 = inlined_call_operand.hbm [shape: f32[2,32,64], index: 13, kind: output, shape index: {}]  }
   0x1   :  { %20 = vsyncpa [#allocation3 + $0x1], 0  ;;  %s3864_s25 = smov 0   ;;  %s3866_s26 = smov 0  }
   0x2   :  { %s3868_s27 = smov 0   ;;  %s3870_s28 = smov 0  }
   0x3 LB: > { %4674 = sst [smem:[#allocation5_spill]] %s3783_s27  ;;  %s3885_s29 = sadd.s32 4294967295, %s3787_s28   ;;  %s3787_s28 = sphi %s3870_s28, %s4681_s28   ;;  %s3783_s27 = sphi %s3868_s27, %s4683_s27   ;;  %s3779_s26 = sphi %s3866_s26, %s4685_s26   ;;  %s3775_s25 = sphi %s3864_s25, %s4684_s25  }
   0x4   : > { %s2916_s30 = sadd.s32 4294967294, %s3787_s28   ;;  %s3889_s14 = sadd.s32 1, %s3787_s28  }
   0x5   : > { %4675 = sst [smem:[#allocation6_spill]] %s3889_s14  ;;  %s311_s15 = sadd.s32 1, %s3783_s27 }
   0x6   : > { %s308_s16 = ssub.s32 %s3787_s28, %s3889_s14  ;;  %p321_p0 = scmp.ne.s32.totalorder %s3783_s27, %s3779_s26 }
   0x7   : > { %p309_p1 = scmp.eq.s32.totalorder %s308_s16, 0  ;;  %p322_p2 = scmp.eq.s32.totalorder %s3885_s29, 1 }
   0x8   : > { %p327_p3 = scmp.ne.s32.totalorder %s3779_s26, %s3775_s25  ;;  %p328_p4 = scmp.eq.s32.totalorder %s2916_s30, 1 }
   0x9   : > { %s3900_s17 = scalar_select %p309_p1, %s3783_s27, %s311_s15  }
   0xa   : > { %p3902_p5 = por %p322_p2, %p321_p0  ;;  %p3906_p6 = por %p328_p4, %p327_p3 }
   0xb   : > { %4676 = sst [smem:[#allocation7_spill]] %s3900_s17  ;;  %p2919_p7 = scmp.ge.s32.totalorder %s3787_s28, 1 }
   0xc   : > { %s4678_s19 = scalar_select %p3906_p6, 1, 0 }
   0xd   : > { %p390_p8 = scmp.lt.s32.totalorder %s3787_s28, 3 }
   0xe   : > { %4679 = sst [smem:[#allocation8_spill]] %s4678_s19 }
   0xf   : > { %p391_p9 = pnand %p2919_p7, %p390_p8 }
  0x10   : > { %v3501_v0 = vld [vmem:[%s4657_s1 + $0x4] ss:$20 sps:$4 sm:$0xff] (!%p391_p9)   ;;  %v3503_v1 = vld [vmem:[%s4657_s1 + $0xc] ss:$20 sps:$4 sm:$0xff] (!%p391_p9)   ;;  %v3506_v3 = vld [vmem:[%s4657_s1 + $0x8] ss:$20 sps:$4 sm:$0xff] (!%p391_p9)  }
  0x11   : > { %394 = sbr.rel (%p391_p9) target bundleno = 2484 (0x9b4), region = 72  ;;  %960 = vmatprep.subr.bf16.mxu0 (!%p391_p9), %v3501_v0  ;;  %v3505_v2 = vld [vmem:[%s4657_s1] ss:$20 sps:$4 sm:$0xff] (!%p391_p9)   ;;  %1001 = vmatprep.subr.bf16.mxu1 (!%p391_p9), %v3503_v1  ;;  %v3511_v6 = vld [vmem:[%s4657_s1 + $0x28] ss:$20 sps:$4 sm:$0xff] (!%p391_p9)   ;;  %p434_p10 = scmp.lt.s32.totalorder (!%p391_p9), %s3885_s29, 1 }
  0x12   : > { %v3507_v4 = vld [vmem:[%s4657_s1 + $0x2c] ss:$20 sps:$4 sm:$0xff] (!%p391_p9)   ;;  %961 = vmatpush1.bf16.msra.mxu0 (!%p391_p9), %v3505_v2  ;;  %1002 = vmatpush1.bf16.msra.mxu1 (!%p391_p9), %v3506_v3  ;;  %v3509_v5 = vld [vmem:[%s4657_s1 + $0x34] ss:$20 sps:$4 sm:$0xff] (!%p391_p9)   ;;  %v3512_v7 = vld [vmem:[%s4657_s1 + $0x30] ss:$20 sps:$4 sm:$0xff] (!%p391_p9)  }
  0x13   : > { %962 = vmatprep.subr.bf16.mxu0 (!%p391_p9), %v3507_v4  ;;  %1003 = vmatprep.subr.bf16.mxu1 (!%p391_p9), %v3509_v5  ;;  %v3513_v8 = vld [vmem:[%s4657_s1 + $0x54] ss:$20 sps:$4 sm:$0xff] (!%p391_p9)   ;;  %v3515_v9 = vld [vmem:[%s4657_s1 + $0x5c] ss:$20 sps:$4 sm:$0xff] (!%p391_p9)   ;;  %v3518_v11 = vld [vmem:[%s4657_s1 + $0x58] ss:$20 sps:$4 sm:$0xff] (!%p391_p9)  }
  0x14   : > { %v3517_v10 = vld [vmem:[%s4657_s1 + $0x50] ss:$20 sps:$4 sm:$0xff] (!%p391_p9)   ;;  %v3523_v14 = vld [vmem:[%s4657_s1 + $0x78] ss:$20 sps:$4 sm:$0xff] (!%p391_p9)   ;;  %v3524_v15 = vld [vmem:[%s4657_s1 + $0x80] ss:$20 sps:$4 sm:$0xff] (!%p391_p9)  }
  0x15   : > { %v3519_v12 = vld [vmem:[%s4657_s1 + $0x7c] ss:$20 sps:$4 sm:$0xff] (!%p391_p9)   ;;  %v3521_v13 = vld [vmem:[%s4657_s1 + $0x84] ss:$20 sps:$4 sm:$0xff] (!%p391_p9)   ;;  %v3527_v17 = vld [vmem:[%s4657_s1 + $0xac] ss:$20 sps:$4 sm:$0xff] (!%p391_p9)  }
  0x16   : > { %963 = vmatpush1.bf16.msra.mxu0 (!%p391_p9), %v3511_v6  ;;  %1004 = vmatpush1.bf16.msra.mxu1 (!%p391_p9), %v3512_v7  ;;  %v3525_v16 = vld [vmem:[%s4657_s1 + $0xa4] ss:$20 sps:$4 sm:$0xff] (!%p391_p9)   ;;  %v3529_v18 = vld [vmem:[%s4657_s1 + $0xa0] ss:$20 sps:$4 sm:$0xff] (!%p391_p9)   ;;  %v3530_v19 = vld [vmem:[%s4657_s1 + $0xa8] ss:$20 sps:$4 sm:$0xff] (!%p391_p9)  }
  0x17   : > { %964 = vmatprep.subr.bf16.mxu0 (!%p391_p9), %v3513_v8  ;;  %1005 = vmatprep.subr.bf16.mxu1 (!%p391_p9), %v3515_v9  ;;  %v3531_v20 = vld [vmem:[%s4657_s1 + $0xcc] ss:$20 sps:$4 sm:$0xff] (!%p391_p9)   ;;  %v3533_v21 = vld [vmem:[%s4657_s1 + $0xd4] ss:$20 sps:$4 sm:$0xff] (!%p391_p9)   ;;  %v3536_v23 = vld [vmem:[%s4657_s1 + $0xd0] ss:$20 sps:$4 sm:$0xff] (!%p391_p9)  }
  0x18   : > { %v3535_v22 = vld [vmem:[%s4657_s1 + $0xc8] ss:$20 sps:$4 sm:$0xff]   ;;  %v3541_v26 = vld [vmem:[%s4657_s1 + $0xf0] ss:$20 sps:$4 sm:$0xff]   ;;  %v3542_v27 = vld [vmem:[%s4657_s1 + $0xf8] ss:$20 sps:$4 sm:$0xff]  }
  0x19   : > { %v3537_v24 = vld [vmem:[%s4657_s1 + $0xf4] ss:$20 sps:$4 sm:$0xff]   ;;  %v3539_v25 = vld [vmem:[%s4657_s1 + $0xfc] ss:$20 sps:$4 sm:$0xff]   ;;  %v3545_v29 = vld [vmem:[%s4657_s1 + $0x124] ss:$20 sps:$4 sm:$0xff]  }
  0x1a   : > { %965 = vmatpush1.bf16.msra.mxu0 %v3517_v10  ;;  %1006 = vmatpush1.bf16.msra.mxu1 %v3518_v11  ;;  %v3543_v28 = vld [vmem:[%s4657_s1 + $0x11c] ss:$20 sps:$4 sm:$0xff]   ;;  %v3547_v30 = vld [vmem:[%s4657_s1 + $0x118] ss:$20 sps:$4 sm:$0xff]   ;;  %v3548_v31 = vld [vmem:[%s4657_s1 + $0x120] ss:$20 sps:$4 sm:$0xff]  }
  0x1b   : > { %966 = vmatprep.subr.bf16.mxu0 %v3519_v12  ;;  %1007 = vmatprep.subr.bf16.mxu1 %v3521_v13  ;;  %v3549_v32 = vld [vmem:[%s4657_s1 + $0x144] ss:$20 sps:$4 sm:$0xff]   ;;  %v3551_v33 = vld [vmem:[%s4657_s1 + $0x14c] ss:$20 sps:$4 sm:$0xff]   ;;  %v3554_v35 = vld [vmem:[%s4657_s1 + $0x148] ss:$20 sps:$4 sm:$0xff]  }
  0x1c   : > { %v3553_v34 = vld [vmem:[%s4657_s1 + $0x140] ss:$20 sps:$4 sm:$0xff]   ;;  %s435_s24 = scalar_select %p434_p10, %s3885_s29, 1  ;;  %v3559_v38 = vld [vmem:[%s4657_s1 + $0x168] ss:$20 sps:$4 sm:$0xff]   ;;  %vm1141_vm0 = vcmask 588800  }
  0x1d   : > { %v3555_v36 = vld [vmem:[%s4657_s1 + $0x16c] ss:$20 sps:$4 sm:$0xff]   ;;  %v3557_v37 = vld [vmem:[%s4657_s1 + $0x174] ss:$20 sps:$4 sm:$0xff]   ;;  %v3560_v39 = vld [vmem:[%s4657_s1 + $0x170] ss:$20 sps:$4 sm:$0xff]  }
  0x1e   : > { %967 = vmatpush1.bf16.msra.mxu0 %v3523_v14  ;;  %1008 = vmatpush1.bf16.msra.mxu1 %v3524_v15  ;;  %v3561_v40 = vld [vmem:[%s4657_s1 + $0x194] ss:$20 sps:$4 sm:$0xff]   ;;  %s3116_s23 = sshll.u32 %s435_s24, 3  ;;  %v3563_v41 = vld [vmem:[%s4657_s1 + $0x19c] ss:$20 sps:$4 sm:$0xff]   ;;  %s3789_s22 = smov 64  }
  0x1f   : > { %968 = vmatprep.subr.bf16.mxu0 %v3525_v16  ;;  %1009 = vmatprep.subr.bf16.mxu1 %v3527_v17  ;;  %v3565_v42 = vld [vmem:[%s4657_s1 + $0x190] ss:$20 sps:$4 sm:$0xff]   ;;  %v3566_v43 = vld [vmem:[%s4657_s1 + $0x198] ss:$20 sps:$4 sm:$0xff]   ;;  %s438_s21 = scalar_lea.vmem %s4656_s0, %s3116_s23  ;;  %v3572_v48 = vld [vmem:[%s4657_s1 + $0x1c0] ss:$20 sps:$4 sm:$0xff]  }
  0x20   : > { %v3567_v44 = vld [vmem:[%s4657_s1 + $0x1bc] ss:$20 sps:$4 sm:$0xff]   ;;  %v3569_v45 = vld [vmem:[%s4657_s1 + $0x1c4] ss:$20 sps:$4 sm:$0xff]   ;;  %v3575_v51 = vld [vmem:[%s4657_s1 + $0x1ec] ss:$20 sps:$4 sm:$0xff]  }
  0x21   : > { %v3571_v46 = vld [vmem:[%s4657_s1 + $0x1b8] ss:$20 sps:$4 sm:$0xff]   ;;  %v440_v47 = vld [vmem:[%s438_s21] sm:$0xff]  ;;  %v3578_v53 = vld [vmem:[%s4657_s1 + $0x1e8] ss:$20 sps:$4 sm:$0xff]   ;;  %vm1148_vm1 = vcmask 1043456  }
  0x22   : > { %969 = vmatpush1.bf16.msra.mxu0 %v3529_v18  ;;  %1010 = vmatpush1.bf16.msra.mxu1 %v3530_v19  ;;  %v2924_v49 = vcombine.high %v440_v47, %v440_v47  ;;  %v3573_v50 = vld [vmem:[%s4657_s1 + $0x1e4] ss:$20 sps:$4 sm:$0xff]   ;;  %v3577_v52 = vld [vmem:[%s4657_s1 + $0x1e0] ss:$20 sps:$4 sm:$0xff]   ;;  %v3583_v56 = vld [vmem:[%s4657_s1 + $0x208] ss:$20 sps:$4 sm:$0xff]   ;;  %v2923_v4 = vcombine.low %v440_v47, %v440_v47 }
  0x23   : > { %970 = vmatprep.subr.bf16.mxu0 %v3531_v20  ;;  %1011 = vmatprep.subr.bf16.mxu1 %v3533_v21  ;;  %v3579_v54 = vld [vmem:[%s4657_s1 + $0x20c] ss:$20 sps:$4 sm:$0xff]   ;;  %v3581_v55 = vld [vmem:[%s4657_s1 + $0x214] ss:$20 sps:$4 sm:$0xff]   ;;  %v3584_v57 = vld [vmem:[%s4657_s1 + $0x210] ss:$20 sps:$4 sm:$0xff]  }
  0x24   : > { %992 = vmatprep.mubr.bf16.mxu0 %v2924_v49  ;;  %1033 = vmatprep.mubr.bf16.mxu1 %v2924_v49  ;;  %v3585_v58 = vld [vmem:[%s4657_s1 + $0x234] ss:$20 sps:$4 sm:$0xff]   ;;  %v3587_v59 = vld [vmem:[%s4657_s1 + $0x23c] ss:$20 sps:$4 sm:$0xff]   ;;  %v3590_v61 = vld [vmem:[%s4657_s1 + $0x238] ss:$20 sps:$4 sm:$0xff]  }
  0x25   : > { %v3589_v60 = vld [vmem:[%s4657_s1 + $0x230] ss:$20 sps:$4 sm:$0xff]   ;;  %v3595_v0 = vld [vmem:[%s4657_s1 + $0x258] ss:$20 sps:$4 sm:$0xff]   ;;  %v3596_v1 = vld [vmem:[%s4657_s1 + $0x260] ss:$20 sps:$4 sm:$0xff]  }
  0x26   : > { %971 = vmatpush1.bf16.msra.mxu0 %v3535_v22  ;;  %1012 = vmatpush1.bf16.msra.mxu1 %v3536_v23  ;;  %v3591_v62 = vld [vmem:[%s4657_s1 + $0x25c] ss:$20 sps:$4 sm:$0xff]   ;;  %v3593_v63 = vld [vmem:[%s4657_s1 + $0x264] ss:$20 sps:$4 sm:$0xff]   ;;  %v3603_v7 = vld [vmem:[%s4657_s1 + $0x1a0] ss:$20 sps:$4 sm:$0xff]  }
  0x27   : > { %972 = vmatprep.subr.bf16.mxu0 %v3537_v24  ;;  %1013 = vmatprep.subr.bf16.mxu1 %v3539_v25  ;;  %v3599_v2 = vld [vmem:[%s4657_s1 + $0x150] ss:$20 sps:$4 sm:$0xff]   ;;  %v3601_v5 = vld [vmem:[%s4657_s1 + $0x178] ss:$20 sps:$4 sm:$0xff]   ;;  %v3604_v8 = vld [vmem:[%s4657_s1 + $0x60] ss:$20 sps:$4 sm:$0xff]  }
  0x28   : > { %v3600_v3 = vld [vmem:[%s4657_s1 + $0x10] ss:$20 sps:$4 sm:$0xff]   ;;  %v3602_v6 = vld [vmem:[%s4657_s1 + $0x38] ss:$20 sps:$4 sm:$0xff]   ;;  %v3605_v9 = vld [vmem:[%s4657_s1 + $0x1c8] ss:$20 sps:$4 sm:$0xff]  }
  0x29   : > { %v3606_v10 = vld [vmem:[%s4657_s1 + $0x88] ss:$20 sps:$4 sm:$0xff]   ;;  %v3607_v11 = vld [vmem:[%s4657_s1 + $0x1f0] ss:$20 sps:$4 sm:$0xff]   ;;  %v3609_v13 = vld [vmem:[%s4657_s1 + $0x218] ss:$20 sps:$4 sm:$0xff]  }
  0x2a   : > { %973 = vmatpush1.bf16.msra.mxu0 %v3541_v26  ;;  %1014 = vmatpush1.bf16.msra.mxu1 %v3542_v27  ;;  %v3608_v12 = vld [vmem:[%s4657_s1 + $0xb0] ss:$20 sps:$4 sm:$0xff]   ;;  %v3610_v14 = vld [vmem:[%s4657_s1 + $0xd8] ss:$20 sps:$4 sm:$0xff]   ;;  %v3611_v15 = vld [vmem:[%s4657_s1 + $0x240] ss:$20 sps:$4 sm:$0xff]  }
  0x2b   : > { %974 = vmatprep.subr.bf16.mxu0 %v3543_v28  ;;  %1015 = vmatprep.subr.bf16.mxu1 %v3545_v29  ;;  %v3612_v16 = vld [vmem:[%s4657_s1 + $0x100] ss:$20 sps:$4 sm:$0xff]   ;;  %v3613_v17 = vld [vmem:[%s4657_s1 + $0x268] ss:$20 sps:$4 sm:$0xff]   ;;  %vm1335_vm2 = vcmask 523264   ;;  %vm1641_vm3 = vcmask 261120  }
  0x2c   : > { %v3614_v18 = vld [vmem:[%s4657_s1 + $0x128] ss:$20 sps:$4 sm:$0xff]   ;;  %v3615_v27 = vld [vmem:[%s4658_s2] sm:$0xff]   ;;  %s431_s16 = sand.u32 1, %s3779_s26   ;;  %s3117_s17 = sshll.u32 %s3885_s29, 9 }
  0x2d   : > { %v1108_v28 = vld [vmem:[%s4659_s3 + $0x8] sm:$0xff]  ;;  %v1107_v29 = vld [vmem:[%s4659_s3] sm:$0xff]  ;;  %s2920_s19 = sshll.u32 %s431_s16, 5  ;;  %s4610_s24 = scalar_lea.hbm %s4669_s13, %s3117_s17 }
  0x2e   : > { %975 = vmatpush1.bf16.msra.mxu0 %v3547_v30  ;;  %1016 = vmatpush1.bf16.msra.mxu1 %v3548_v31  ;;  %v3790_v30 = vmov 0   ;;  %v1109_v31 = vld [vmem:[%s4659_s3 + $0x10] sm:$0xff]  ;;  %s433_s27 = scalar_lea.vmem [#allocation2], %s2920_s19  ;;  %s4615_s14 = scalar_lea.sflag [#allocation3], %s431_s16 }
  0x2f   : > { %976 = vmatprep.subr.bf16.mxu0 %v3549_v32  ;;  %1017 = vmatprep.subr.bf16.mxu1 %v3551_v33  ;;  %v1110_v32 = vld [vmem:[%s4659_s3 + $0x18] sm:$0xff]  ;;  %s2854_s23 = sshll.u32 %s433_s27, 4  ;;  %s3791_s21 = smov [#allocation2]   ;;  %s4604_s23 = int_to_ptr.vmem [resolvable:$true] %s2854_s23 }
  0x30   : > { %3380 = vset.pattern.permute.xlu1 %v3790_v30  ;;  %3379 = vset.pattern.permute.xlu0 %v3790_v30  ;;  %s3725_s29 = scalar_lea.vmem %s4604_s23, 512  ;;  %s3729_s30 = sshll.u32 %s3791_s21, 4  ;;  %s3730_s30 = int_to_ptr.vmem [resolvable:$false] %s3729_s30 }
  0x31   : > { %p3726_p11 = scmp.ne.s32.totalorder %s4604_s23, %s3725_s29  ;;  %s3731_s15 = scalar_lea.vmem %s3730_s30, 1024 }
  0x32   : > { %977 = vmatpush1.bf16.msra.mxu0 %v3553_v34  ;;  %1018 = vmatpush1.bf16.msra.mxu1 %v3554_v35  ;;  %p3732_p0 = scmp.lt.s32.totalorder %s4604_s23, %s3730_s30  ;;  %p3733_p1 = scmp.lt.s32.totalorder %s3731_s15, %s3725_s29 }
  0x33   : > { %978 = vmatprep.subr.bf16.mxu0 %v3555_v36  ;;  %1019 = vmatprep.subr.bf16.mxu1 %v3557_v37  ;;  %p3727_p12 = pnand %p3726_p11, %p3902_p5 }
  0x34   : > { %p3734_p2 = por %p3733_p1, %p3732_p0 }
  0x35   : > { %p3728_p13 = pneg %p3727_p12 }
  0x36   : > { %979 = vmatpush1.bf16.msra.mxu0 %v3559_v38  ;;  %1020 = vmatpush1.bf16.msra.mxu1 %v3560_v39 }
  0x37   : > { %980 = vmatprep.subr.bf16.mxu0 %v3561_v40  ;;  %1021 = vmatprep.subr.bf16.mxu1 %v3563_v41  ;;  %p3735_p3 = pnand %p3734_p2, %p3728_p13 }
  0x3a   : > { %981 = vmatpush1.bf16.msra.mxu0 %v3565_v42  ;;  %1022 = vmatpush1.bf16.msra.mxu1 %v3566_v43 }
  0x3b   : > { %982 = vmatprep.subr.bf16.mxu0 %v3567_v44  ;;  %1023 = vmatprep.subr.bf16.mxu1 %v3569_v45 }
  0x3e   : > { %983 = vmatpush1.bf16.msra.mxu0 %v3571_v46  ;;  %1024 = vmatpush1.bf16.msra.mxu1 %v3572_v48  ;;  %v3619_v48 = vld [vmem:[%s4660_s4 + $0x4] ss:$20 sps:$4 sm:$0xff]  }
  0x3f   : > { %984 = vmatprep.subr.bf16.mxu0 %v3573_v50  ;;  %1025 = vmatprep.subr.bf16.mxu1 %v3575_v51  ;;  %v3617_v50 = vld [vmem:[%s4660_s4] ss:$20 sps:$4 sm:$0xff]  }
  0x40   : > { %v3622_v51 = vld [vmem:[%s4660_s4 + $0x2c] ss:$20 sps:$4 sm:$0xff]  }
  0x42   : > { %985 = vmatpush1.bf16.msra.mxu0 %v3577_v52  ;;  %1026 = vmatpush1.bf16.msra.mxu1 %v3578_v53  ;;  %v3620_v52 = vld [vmem:[%s4660_s4 + $0x28] ss:$20 sps:$4 sm:$0xff]  }
  0x43   : > { %986 = vmatprep.subr.bf16.mxu0 %v3579_v54  ;;  %1027 = vmatprep.subr.bf16.mxu1 %v3581_v55  ;;  %v3625_v53 = vld [vmem:[%s4660_s4 + $0x54] ss:$20 sps:$4 sm:$0xff]   ;;  %v3623_v54 = vld [vmem:[%s4660_s4 + $0x50] ss:$20 sps:$4 sm:$0xff]  }
  0x44   : > { %v3628_v55 = vld [vmem:[%s4660_s4 + $0x7c] ss:$20 sps:$4 sm:$0xff]  }
  0x46   : > { %987 = vmatpush1.bf16.msra.mxu0 %v3583_v56  ;;  %1028 = vmatpush1.bf16.msra.mxu1 %v3584_v57  ;;  %v3626_v56 = vld [vmem:[%s4660_s4 + $0x78] ss:$20 sps:$4 sm:$0xff]  }
  0x47   : > { %988 = vmatprep.subr.bf16.mxu0 %v3585_v58  ;;  %1029 = vmatprep.subr.bf16.mxu1 %v3587_v59  ;;  %v3631_v57 = vld [vmem:[%s4660_s4 + $0xc] ss:$20 sps:$4 sm:$0xff]  }
  0x4a   : > { %989 = vmatpush1.bf16.msra.mxu0 %v3589_v60  ;;  %1030 = vmatpush1.bf16.msra.mxu1 %v3590_v61 }
  0x4b   : > { %990 = vmatprep.subr.bf16.mxu0 %v3591_v62  ;;  %1031 = vmatprep.subr.bf16.mxu1 %v3593_v63 }
  0x4e   : > { %991 = vmatpush1.bf16.msra.mxu0 %v3595_v0  ;;  %1032 = vmatpush1.bf16.msra.mxu1 %v3596_v1 }
  0x4f   : > { %3118 = vmatprep.subr.bf16.mxu0 %v3599_v2 }
  0x51   : > { %993 = vmatmul.mubr.bf16.vlgmr.msra.gmra.mrb[0].mxu0 %v2923_v4  ;;  %1034 = vmatmul.mubr.bf16.vlgmr.msra.gmra.mrb[0].mxu1 %v2923_v4 }
  0x52   : > { %3119 = vmatpush3.bf16.msra.mxu0 %v3600_v3  ;;  %1074 = vmatprep.mubr.bf16.mxu0 %v2924_v49  ;;  %v3616_v49 = vld [vmem:[%s4658_s2 + $0x8] sm:$0xff]  }
  0x53   : > { %3120 = vmatprep.subr.bf16.mxu0 %v3601_v5  ;;  %3271 = vmatprep.mubr.msk.bf16.mxu1 %vm1141_vm0, %v3615_v27 }
  0x56   : > { %3121 = vmatpush3.bf16.msra.mxu0 %v3602_v6 }
  0x57   : > { %3122 = vmatprep.subr.bf16.mxu0 %v3603_v7 }
  0x5a   : > { %3123 = vmatpush3.bf16.msra.mxu0 %v3604_v8 }
  0x5b   : > { %3124 = vmatprep.subr.bf16.mxu0 %v3605_v9 }
  0x5e   : > { %3125 = vmatpush3.bf16.msra.mxu0 %v3606_v10 }
  0x5f   : > { %3126 = vmatprep.subr.bf16.mxu0 %v3607_v11  ;;  %v3629_v11 = vld [vmem:[%s4660_s4 + $0x8] ss:$20 sps:$4 sm:$0xff]  }
  0x62   : > { %3127 = vmatpush3.bf16.msra.mxu0 %v3608_v12 }
  0x63   : > { %3128 = vmatprep.subr.bf16.mxu0 %v3609_v13  ;;  %v3634_v13 = vld [vmem:[%s4660_s4 + $0x34] ss:$20 sps:$4 sm:$0xff]  }
  0x66   : > { %3129 = vmatpush3.bf16.msra.mxu0 %v3610_v14  ;;  %v3632_v14 = vld [vmem:[%s4660_s4 + $0x30] ss:$20 sps:$4 sm:$0xff]  }
  0x67   : > { %3130 = vmatprep.subr.bf16.mxu0 %v3611_v15  ;;  %v3637_v15 = vld [vmem:[%s4660_s4 + $0x5c] ss:$20 sps:$4 sm:$0xff]  }
  0x6a   : > { %3131 = vmatpush3.bf16.msra.mxu0 %v3612_v16  ;;  %v3635_v16 = vld [vmem:[%s4660_s4 + $0x58] ss:$20 sps:$4 sm:$0xff]  }
  0x6b   : > { %3132 = vmatprep.subr.bf16.mxu0 %v3613_v17  ;;  %v3640_v17 = vld [vmem:[%s4660_s4 + $0x84] ss:$20 sps:$4 sm:$0xff]  }
  0x6e   : > { %3133 = vmatpush3.bf16.msra.mxu0 %v3614_v18  ;;  %v3638_v18 = vld [vmem:[%s4660_s4 + $0x80] ss:$20 sps:$4 sm:$0xff]  }
  0x71   : > { %1075 = vmatmul.mubr.bf16.vlgmr.msra.gmra.mrb[4].mxu0 %v2923_v4 }
 0x124   : > { %v994_v19 = vpop.f32.mrb[0].mxu0  ;;  %v1035_v20 = vpop.f32.mrb[0].mxu1 }
 0x125   : > { %1091 = vrot.lane.b32.xlu1 %v1035_v20, %s3789_s22  ;;  %1083 = vrot.lane.b32.xlu0 %v994_v19, %s3789_s22  ;;  %v996_v21 = vpop.f32.mrb[1].mxu0  ;;  %v1037_v22 = vpop.f32.mrb[1].mxu1 }
 0x126   : > { %v998_v23 = vpop.f32.mrb[2].mxu0  ;;  %v1039_v24 = vpop.f32.mrb[2].mxu1 }
 0x127   : > { %v999_v25 = vpop.f32.mrb[3].mxu0  ;;  %v1040_v26 = vpop.f32.mrb[3].mxu1 }
 0x129   : > { %1095 = vrot.lane.b32.xlu1 %v1037_v22, %s3789_s22  ;;  %1087 = vrot.lane.b32.xlu0 %v996_v21, %s3789_s22 }
 0x12d   : > { %1118 = vperm.xlu1 %3380, %v1108_v28   ;;  %1113 = vperm.xlu0 %3379, %v1107_v29  }
 0x131   : > { %1123 = vperm.xlu1 %3380, %v1109_v31   ;;  %1128 = vperm.xlu0 %3379, %v1110_v32  }
 0x144   : > { %v3134_v33 = vpop.f32.mrb[4].mxu0 }
 0x145   : > { %v3135_v34 = vpop.f32.mrb[5].mxu0 }
 0x146   : > { %v3136_v35 = vadd.f32 %v3135_v34, %v3134_v33  ;;  %v3137_v36 = vpop.f32.mrb[6].mxu0 }
 0x147   : > { %v3138_v37 = vpop.f32.mrb[7].mxu0 }
 0x148   : > { %v1106_v46 = vpack.c.bf16 %v3136_v35, %v3136_v35 }
 0x14a   : > { %v1150_v47 = vsel %vm1148_vm1, %v1106_v46, 0 }
 0x197   : > { %v1084_v38 = vpop.permute.xlu0 %1083  ;;  %v1092_v40 = vpop.permute.xlu1 %1091 }
 0x198   : > { %v1102_v39 = vpack.c.bf16 %v1084_v38, %v994_v19  ;;  %v1104_v43 = vpack.c.bf16 %v1092_v40, %v1035_v20  ;;  %v3641_v19 = vld [vmem:[%s4660_s4 + $0x10] ss:$20 sps:$4 sm:$0xff]   ;;  %v3642_v20 = vld [vmem:[%s4660_s4 + $0x38] ss:$20 sps:$4 sm:$0xff]  }
 0x19a   : > { %3261 = vmatprep.subr.bf16.mxu1 %v1102_v39 }
 0x19b   : > { %3262 = vmatpush3.bf16.msra.mxu1 %v1102_v39  ;;  %v1088_v41 = vpop.permute.xlu0 %1087  ;;  %v1096_v44 = vpop.permute.xlu1 %1095 }
 0x19c   : > { %v1103_v42 = vpack.c.bf16 %v1088_v41, %v996_v21  ;;  %v1105_v45 = vpack.c.bf16 %v1096_v44, %v1037_v22  ;;  %v3643_v21 = vld [vmem:[%s4660_s4 + $0x60] ss:$20 sps:$4 sm:$0xff]   ;;  %v3644_v22 = vld [vmem:[%s4660_s4 + $0x88] ss:$20 sps:$4 sm:$0xff]  }
 0x19e   : > { %3263 = vmatprep.subr.bf16.mxu1 %v1103_v42 }
 0x19f   : > { %3264 = vmatpush3.bf16.msra.mxu1 %v1103_v42 }
 0x1a0   : > { %3265 = vmatprep.subr.bf16.mxu1 %v1104_v43 }
 0x1a3   : > { %3266 = vmatpush3.bf16.msra.mxu1 %v1104_v43 }
 0x1a4   : > { %3267 = vmatprep.subr.bf16.mxu1 %v1105_v45 }
 0x1a7   : > { %3268 = vmatpush3.bf16.msra.mxu1 %v1105_v45 }
 0x1a8   : > { %3335 = vmatprep.subr.msk.bf16.mxu1 %vm1148_vm1, %v1106_v46 }
 0x1ab   : > { %3270 = vmatpush3.bf16.msra.mxu1 %v1150_v47 }
 0x1ac   : > { %1342 = vmatprep.subr.bf16.mxu1 %v3619_v48  ;;  %v1119_v58 = vpop.permute.xlu1 %1118  ;;  %v1114_v59 = vpop.permute.xlu0 %1113  ;;  %v1588_v48 = vld [vmem:[%s4662_s6 + $0x8] sm:$0xff] }
 0x1ae   : > { %3272 = vmatmul.mubr.msk.bf16.vlgmr.msra.gmra.mrb[4].mxu1 %vm1141_vm0, %v3616_v49 }
 0x1af   : > { %1343 = vmatpush1.bf16.msra.mxu1 %v3617_v50  ;;  %1374 = vmatprep.mubr.bf16.mxu1 %v3790_v30 }
 0x1b0   : > { %1344 = vmatprep.subr.bf16.mxu1 %v3622_v51  ;;  %v1124_v60 = vpop.permute.xlu1 %1123  ;;  %v1129_v62 = vpop.permute.xlu0 %1128 }
 0x1b3   : > { %1345 = vmatpush1.bf16.msra.mxu1 %v3620_v52  ;;  %v1590_v52 = vld [vmem:[%s4662_s6 + $0x18] sm:$0xff] }
 0x1b4   : > { %1346 = vmatprep.subr.bf16.mxu1 %v3625_v53 }
 0x1b7   : > { %1347 = vmatpush1.bf16.msra.mxu1 %v3623_v54 }
 0x1b8   : > { %1348 = vmatprep.subr.bf16.mxu1 %v3628_v55 }
 0x1bb   : > { %1349 = vmatpush1.bf16.msra.mxu1 %v3626_v56 }
 0x1bc   : > { %1395 = vmatprep.subr.bf16.mxu1 %v3631_v57 }
 0x281   : > { %v3273_v61 = vpop.f32.mrb[4].mxu1 }
 0x282   : > { %v1195_v63 = vadd.f32 %v3273_v61, %v1124_v60  ;;  %v1186_v0 = vpop.f32.mrb[5].mxu1 }
 0x283   : > { %v1187_v1 = vadd.f32 %v1186_v0, %v1114_v59  ;;  %v3274_v2 = vpop.f32.mrb[6].mxu1  ;;  %v3647_v0 = vld [vmem:[%s4661_s5 + $0x4] ss:$12 sps:$4 sm:$0xff]  }
 0x284   : > { %v1198_v3 = vadd.f32 %v3274_v2, %v1129_v62  ;;  %v1189_v4 = vpop.f32.mrb[7].mxu1  ;;  %v1203_v6 = vmax.f32 %v1195_v63, 0.0  ;;  %v1587_v2 = vld [vmem:[%s4662_s6] sm:$0xff]  ;;  %1680 = vmatprep.mubr.bf16.mxu0 %v3647_v0 }
 0x285   : > { %v1190_v5 = vadd.f32 %v1189_v4, %v1119_v58  ;;  %v1201_v8 = vmax.f32 %v1187_v1, 0.0  ;;  %v3648_v1 = vld [vmem:[%s4661_s5 + $0x8] ss:$12 sps:$4 sm:$0xff]   ;;  %v3649_v4 = vld [vmem:[%s4661_s5 + $0x20] ss:$12 sps:$4 sm:$0xff]  }
 0x286   : > { %v1204_v7 = vmax.f32 %v1198_v3, 0.0  ;;  %v1589_v3 = vld [vmem:[%s4662_s6 + $0x10] sm:$0xff] }
 0x287   : > { %v1202_v9 = vmax.f32 %v1190_v5, 0.0  ;;  %v3653_v5 = vld [vmem:[%s4663_s7] ss:$20 sps:$4 sm:$0xff]  }
 0x288   : > { %v1206_v10 = vpack.c.bf16 %v1204_v7, %v1203_v6  ;;  %v3655_v6 = vld [vmem:[%s4663_s7 + $0x4] ss:$20 sps:$4 sm:$0xff]  }
 0x289   : > { %v1205_v12 = vpack.c.bf16 %v1202_v9, %v1201_v8 }
 0x28b   : > { %3029 = vmatmul.mubr.msk.bf16.vlgmr.msra.gmra.mrb[8].mxu1 %vm1335_vm2, %v1205_v12 }
 0x28c   : > { %1396 = vmatpush1.bf16.msra.mxu1 %v3629_v11  ;;  %1384 = vmatprep.mubr.bf16.mxu1 %v3790_v30 }
 0x28d   : > { %1397 = vmatprep.subr.bf16.mxu1 %v3634_v13 }
 0x290   : > { %1398 = vmatpush1.bf16.msra.mxu1 %v3632_v14 }
 0x291   : > { %1399 = vmatprep.subr.bf16.mxu1 %v3637_v15 }
 0x293   : > { %3030 = vmatmul.mubr.msk.bf16.gmra.mrb[12].mxu1 %vm1335_vm2, %v1206_v10 }
 0x294   : > { %1400 = vmatpush1.bf16.msra.mxu1 %v3635_v16  ;;  %1427 = vmatprep.mubr.bf16.mxu1 %v3790_v30 }
 0x295   : > { %1401 = vmatprep.subr.bf16.mxu1 %v3640_v17 }
 0x298   : > { %1402 = vmatpush1.bf16.msra.mxu1 %v3638_v18 }
 0x299   : > { %3275 = vmatprep.subr.bf16.mxu1 %v3641_v19 }
 0x29b   : > { %3031 = vmatmul.mubr.msk.bf16.vlgmr.msra.gmra.mrb[16].mxu1 %vm1335_vm2, %v1205_v12 }
 0x29c   : > { %3276 = vmatpush3.bf16.msra.mxu1 %v3641_v19  ;;  %1437 = vmatprep.mubr.bf16.mxu1 %v3790_v30 }
 0x29d   : > { %3277 = vmatprep.subr.bf16.mxu1 %v3642_v20 }
 0x2a0   : > { %3278 = vmatpush3.bf16.msra.mxu1 %v3642_v20 }
 0x2a1   : > { %3279 = vmatprep.subr.bf16.mxu1 %v3643_v21 }
 0x2a3   : > { %3032 = vmatmul.mubr.msk.bf16.gmra.mrb[20].mxu1 %vm1335_vm2, %v1206_v10 }
 0x2a4   : > { %3280 = vmatpush3.bf16.msra.mxu1 %v3643_v21  ;;  %3283 = vmatprep.mubr.msk.bf16.mxu1 %vm1335_vm2, %v1205_v12 }
 0x2a5   : > { %3281 = vmatprep.subr.bf16.mxu1 %v3644_v22 }
 0x2a8   : > { %3282 = vmatpush3.bf16.msra.mxu1 %v3644_v22 }
 0x2ab   : > { %3284 = vmatmul.mubr.msk.bf16.vlgmr.msra.gmra.mrb[24].mxu1 %vm1335_vm2, %v1206_v10 }
 0x2ac   : > { %3291 = vmatprep.mubr.msk.bf16.mxu1 %vm1641_vm3, %v3648_v1 }
 0x35e   : > { %v1376_v23 = vpop.f32.mrb[8].mxu1 }
 0x35f   : > { %v4253_v24 = vpop.f32.mrb[9].mxu1 }
 0x360   : > { %v1380_v25 = vpop.f32.mrb[10].mxu1 }
 0x361   : > { %v3381_v26 = vpack.i.bf16 %v1380_v25, %v1376_v23  ;;  %v1569_v27 = vpack.c.bf16 %v1380_v25, %v1376_v23  ;;  %v4255_v28 = vpop.f32.mrb[11].mxu1 }
 0x362   : > { %v3406_v29 = vpack.i.bf16 %v4255_v28, %v4253_v24  ;;  %v1573_v31 = vpack.c.bf16 %v4255_v28, %v4253_v24  ;;  %v3645_v28 = vld [vmem:[%s4661_s5] ss:$12 sps:$4 sm:$0xff]  }
 0x363   : > { %3382 = vrot.lane.b32.xlu0 %v3381_v26, %s3789_s22 }
 0x366   : > { %v1386_v32 = vpop.f32.mrb[12].mxu1 }
 0x367   : > { %v4262_v33 = vpop.f32.mrb[13].mxu1 }
 0x368   : > { %v1390_v34 = vpop.f32.mrb[14].mxu1 }
 0x369   : > { %v3396_v35 = vpack.i.bf16 %v1390_v34, %v1386_v32  ;;  %v1570_v36 = vpack.c.bf16 %v1390_v34, %v1386_v32  ;;  %v4264_v37 = vpop.f32.mrb[15].mxu1 }
 0x36a   : > { %v3416_v38 = vpack.i.bf16 %v4264_v37, %v4262_v33  ;;  %v1574_v39 = vpack.c.bf16 %v4264_v37, %v4262_v33  ;;  %v3652_v33 = vld [vmem:[%s4661_s5 + $0x18] ss:$12 sps:$4 sm:$0xff]   ;;  %v3658_v37 = vld [vmem:[%s4663_s7 + $0x2c] ss:$20 sps:$4 sm:$0xff]  }
 0x36b   : > { %3397 = vrot.lane.b32.xlu0 %v3396_v35, %s3789_s22 }
 0x36e   : > { %v1429_v40 = vpop.f32.mrb[16].mxu1 }
 0x36f   : > { %3407 = vrot.lane.b32.xlu0 %v3406_v29, %s3789_s22  ;;  %v4272_v41 = vpop.f32.mrb[17].mxu1 }
 0x370   : > { %v1433_v42 = vpop.f32.mrb[18].mxu1 }
 0x371   : > { %v3386_v43 = vpack.i.bf16 %v1433_v42, %v1429_v40  ;;  %v1577_v44 = vpack.c.bf16 %v1433_v42, %v1429_v40  ;;  %v4274_v45 = vpop.f32.mrb[19].mxu1 }
 0x372   : > { %v3401_v46 = vpack.i.bf16 %v4274_v45, %v4272_v41  ;;  %v1581_v47 = vpack.c.bf16 %v4274_v45, %v4272_v41  ;;  %v3661_v45 = vld [vmem:[%s4663_s7 + $0x54] ss:$20 sps:$4 sm:$0xff]  }
 0x373   : > { %3417 = vrot.lane.b32.xlu0 %v3416_v38, %s3789_s22  ;;  %3387 = vrot.lane.b32.xlu1 %v3386_v43, %s3789_s22 }
 0x374   : > { %3153 = vmatprep.subr.bf16.mxu0 %v1577_v44 }
 0x375   : > { %3154 = vmatpush3.bf16.msra.mxu0 %v1569_v27 }
 0x376   : > { %v1439_v49 = vpop.f32.mrb[20].mxu1 }
 0x377   : > { %1598 = vperm.xlu0 %3379, %v1588_v48   ;;  %v4285_v50 = vpop.f32.mrb[21].mxu1  ;;  %v3659_v48 = vld [vmem:[%s4663_s7 + $0x50] ss:$20 sps:$4 sm:$0xff]  }
 0x378   : > { %v1443_v51 = vpop.f32.mrb[22].mxu1 }
 0x379   : > { %v3391_v53 = vpack.i.bf16 %v1443_v51, %v1439_v49  ;;  %v1578_v54 = vpack.c.bf16 %v1443_v51, %v1439_v49  ;;  %v1445_v55 = vpop.f32.mrb[23].mxu1 }
 0x37a   : > { %v3411_v56 = vpack.i.bf16 %v1445_v55, %v4285_v50  ;;  %v1582_v57 = vpack.c.bf16 %v1445_v55, %v4285_v50  ;;  %v3669_v55 = vld [vmem:[%s4663_s7 + $0xc] ss:$20 sps:$4 sm:$0xff]  }
 0x37b   : > { %1608 = vperm.xlu0 %3379, %v1590_v52   ;;  %3392 = vrot.lane.b32.xlu1 %v3391_v53, %s3789_s22  ;;  %v3665_v52 = vld [vmem:[%s4663_s7 + $0x7c] ss:$20 sps:$4 sm:$0xff]   ;;  %v3666_v53 = vld [vmem:[%s4663_s7 + $0x38] ss:$20 sps:$4 sm:$0xff]  }
 0x37c   : > { %3155 = vmatprep.subr.bf16.mxu0 %v1578_v54  ;;  %v3663_v54 = vld [vmem:[%s4663_s7 + $0x78] ss:$20 sps:$4 sm:$0xff]  }
 0x37d   : > { %3156 = vmatpush3.bf16.msra.mxu0 %v1570_v36 }
 0x37e   : > { %v3285_v58 = vpop.f32.mrb[24].mxu1 }
 0x37f   : > { %3402 = vrot.lane.b32.xlu1 %v3401_v46, %s3789_s22  ;;  %v1482_v59 = vpop.f32.mrb[25].mxu1  ;;  %v3662_v46 = vld [vmem:[%s4663_s7 + $0x10] ss:$20 sps:$4 sm:$0xff]  }
 0x380   : > { %v3286_v60 = vpop.f32.mrb[26].mxu1 }
 0x381   : > { %v1586_v61 = vpack.c.bf16 %v3286_v60, %v3285_v58  ;;  %v1485_v62 = vpop.f32.mrb[27].mxu1 }
 0x382   : > { %v1585_v63 = vpack.c.bf16 %v1485_v62, %v1482_v59 }
 0x383   : > { %3412 = vrot.lane.b32.xlu1 %v3411_v56, %s3789_s22  ;;  %v3670_v56 = vld [vmem:[%s4663_s7 + $0x60] ss:$20 sps:$4 sm:$0xff]  }
 0x384   : > { %3287 = vmatprep.subr.bf16.mxu1 %v1585_v63 }
 0x385   : > { %3288 = vmatpush3.bf16.msra.mxu1 %v1585_v63 }
 0x386   : > { %3289 = vmatprep.subr.bf16.mxu1 %v1586_v61 }
 0x387   : > { %1593 = vperm.xlu1 %3380, %v1587_v2  }
 0x389   : > { %3290 = vmatpush3.bf16.msra.mxu1 %v1586_v61 }
 0x38a   : > { %1886 = vmatprep.subr.bf16.mxu1 %v3655_v6 }
 0x38b   : > { %1603 = vperm.xlu1 %3380, %v1589_v3  }
 0x38c   : > { %3292 = vmatmul.mubr.msk.bf16.vlgmr.msra.gmra.mrb[28].mxu1 %vm1641_vm3, %v3649_v4 }
 0x38d   : > { %1918 = vmatprep.mubr.bf16.mxu1 %v3790_v30  ;;  %1887 = vmatpush1.bf16.msra.mxu1 %v3653_v5 }
 0x38e   : > { %1888 = vmatprep.subr.bf16.mxu1 %v3658_v37 }
 0x3d5   : > { %v3383_v7 = vpop.permute.xlu0 %3382 }
 0x3d6   : > { %v3385_v8 = vunpack.i.h.bf16 %v3383_v7  ;;  %v3384_v9 = vunpack.i.l.bf16 %v3383_v7 }
 0x3d8   : > { %v1571_v14 = vpack.c.bf16 %v3385_v8, %v3384_v9 }
 0x3dd   : > { %v3398_v15 = vpop.permute.xlu0 %3397 }
 0x3de   : > { %v3400_v16 = vunpack.i.h.bf16 %v3398_v15  ;;  %v3399_v17 = vunpack.i.l.bf16 %v3398_v15 }
 0x3e0   : > { %v1572_v22 = vpack.c.bf16 %v3400_v16, %v3399_v17 }
 0x3e1   : > { %v3408_v25 = vpop.permute.xlu0 %3407 }
 0x3e2   : > { %v3410_v32 = vunpack.i.h.bf16 %v3408_v25  ;;  %v3409_v34 = vunpack.i.l.bf16 %v3408_v25  ;;  %v3677_v25 = vld [vmem:[%s4663_s7 + $0x5c] ss:$20 sps:$4 sm:$0xff]  }
 0x3e4   : > { %v1575_v41 = vpack.c.bf16 %v3410_v32, %v3409_v34  ;;  %v3680_v34 = vld [vmem:[%s4663_s7 + $0x84] ss:$20 sps:$4 sm:$0xff]  }
 0x3e5   : > { %v3388_v10 = vpop.permute.xlu1 %3387  ;;  %v3418_v35 = vpop.permute.xlu0 %3417 }
 0x3e6   : > { %v3390_v11 = vunpack.i.h.bf16 %v3388_v10  ;;  %v3389_v12 = vunpack.i.l.bf16 %v3388_v10  ;;  %v3420_v42 = vunpack.i.h.bf16 %v3418_v35  ;;  %v3419_v43 = vunpack.i.l.bf16 %v3418_v35  ;;  %v3678_v35 = vld [vmem:[%s4663_s7 + $0x80] ss:$20 sps:$4 sm:$0xff]  }
 0x3e8   : > { %v1579_v13 = vpack.c.bf16 %v3390_v11, %v3389_v12  ;;  %v1576_v24 = vpack.c.bf16 %v3420_v42, %v3419_v43 }
 0x3ea   : > { %3157 = vmatprep.subr.bf16.mxu0 %v1579_v13 }
 0x3eb   : > { %3158 = vmatpush3.bf16.msra.mxu0 %v1571_v14  ;;  %v3667_v14 = vld [vmem:[%s4663_s7 + $0x8] ss:$20 sps:$4 sm:$0xff]  }
 0x3ed   : > { %v3393_v18 = vpop.permute.xlu1 %3392 }
 0x3ee   : > { %v3395_v19 = vunpack.i.h.bf16 %v3393_v18  ;;  %v3394_v20 = vunpack.i.l.bf16 %v3393_v18  ;;  %v3673_v18 = vld [vmem:[%s4663_s7 + $0x34] ss:$20 sps:$4 sm:$0xff]  }
 0x3f0   : > { %v1580_v21 = vpack.c.bf16 %v3395_v19, %v3394_v20 }
 0x3f1   : > { %v3403_v23 = vpop.permute.xlu1 %3402 }
 0x3f2   : > { %3159 = vmatprep.subr.bf16.mxu0 %v1580_v21  ;;  %v3405_v26 = vunpack.i.h.bf16 %v3403_v23  ;;  %v3404_v27 = vunpack.i.l.bf16 %v3403_v23 }
 0x3f3   : > { %3160 = vmatpush3.bf16.msra.mxu0 %v1572_v22  ;;  %v3671_v22 = vld [vmem:[%s4663_s7 + $0x30] ss:$20 sps:$4 sm:$0xff]  }
 0x3f4   : > { %3161 = vmatprep.subr.bf16.mxu0 %v1581_v47  ;;  %v1583_v36 = vpack.c.bf16 %v3405_v26, %v3404_v27 }
 0x3f5   : > { %v3413_v29 = vpop.permute.xlu1 %3412 }
 0x3f6   : > { %v3415_v38 = vunpack.i.h.bf16 %v3413_v29  ;;  %v3414_v40 = vunpack.i.l.bf16 %v3413_v29  ;;  %v1599_v2 = vpop.permute.xlu0 %1598  ;;  %v3675_v29 = vld [vmem:[%s4663_s7 + $0x58] ss:$20 sps:$4 sm:$0xff]  }
 0x3f7   : > { %3162 = vmatpush3.bf16.msra.mxu0 %v1573_v31  ;;  %v3650_v31 = vld [vmem:[%s4661_s5 + $0x1c] ss:$12 sps:$4 sm:$0xff]  }
 0x3f8   : > { %3163 = vmatprep.subr.bf16.mxu0 %v1582_v57  ;;  %v1584_v44 = vpack.c.bf16 %v3415_v38, %v3414_v40  ;;  %v3674_v57 = vld [vmem:[%s4663_s7 + $0x88] ss:$20 sps:$4 sm:$0xff]  }
 0x3fa   : > { %v1609_v19 = vpop.permute.xlu0 %1608 }
 0x3fb   : > { %3164 = vmatpush3.bf16.msra.mxu0 %v1574_v39  ;;  %v3656_v39 = vld [vmem:[%s4663_s7 + $0x28] ss:$20 sps:$4 sm:$0xff]  }
 0x3fc   : > { %3165 = vmatprep.subr.bf16.mxu0 %v1583_v36  ;;  %1889 = vmatpush1.bf16.msra.mxu1 %v3656_v39 }
 0x3fd   : > { %1890 = vmatprep.subr.bf16.mxu1 %v3661_v45 }
 0x3ff   : > { %3166 = vmatpush3.bf16.msra.mxu0 %v1575_v41 }
 0x400   : > { %3167 = vmatprep.subr.bf16.mxu0 %v1584_v44  ;;  %1891 = vmatpush1.bf16.msra.mxu1 %v3659_v48 }
 0x401   : > { %1892 = vmatprep.subr.bf16.mxu1 %v3665_v52 }
 0x403   : > { %3168 = vmatpush3.bf16.msra.mxu0 %v1576_v24 }
 0x404   : > { %3295 = vmatprep.subr.bf16.mxu0 %v3662_v46  ;;  %1893 = vmatpush1.bf16.msra.mxu1 %v3663_v54 }
 0x405   : > { %1939 = vmatprep.subr.bf16.mxu1 %v3669_v55 }
 0x406   : > { %1681 = vmatmul.mubr.bf16.vlgmr.msra.gmra.mrb[8].mxu0 %v3645_v28  ;;  %v1594_v62 = vpop.permute.xlu1 %1593 }
 0x407   : > { %1688 = vmatprep.mubr.bf16.mxu0 %v3650_v31  ;;  %3296 = vmatpush3.bf16.msra.mxu0 %v3662_v46 }
 0x408   : > { %3297 = vmatprep.subr.bf16.mxu0 %v3666_v53 }
 0x40a   : > { %v1604_v12 = vpop.permute.xlu1 %1603 }
 0x40b   : > { %3298 = vmatpush3.bf16.msra.mxu0 %v3666_v53 }
 0x40c   : > { %3299 = vmatprep.subr.bf16.mxu0 %v3670_v56 }
 0x40e   : > { %1689 = vmatmul.mubr.bf16.gmra.mrb[12].mxu0 %v3652_v33 }
 0x40f   : > { %3300 = vmatpush3.bf16.msra.mxu0 %v3670_v56 }
 0x410   : > { %3301 = vmatprep.subr.bf16.mxu0 %v3674_v57 }
 0x413   : > { %3302 = vmatpush3.bf16.msra.mxu0 %v3674_v57 }
 0x45f   : > { %v3293_v47 = vpop.f32.mrb[28].mxu1 }
 0x460   : > { %v1731_v49 = vpop.f32.mrb[29].mxu1 }
 0x461   : > { %v3294_v50 = vpop.f32.mrb[30].mxu1 }
 0x462   : > { %v1734_v51 = vpop.f32.mrb[31].mxu1 }
 0x4d9   : > { %v3169_v58 = vpop.f32.mrb[8].mxu0 }
 0x4da   : > { %v3170_v59 = vpop.f32.mrb[9].mxu0 }
 0x4db   : > { %v3171_v60 = vadd.f32 %v3170_v59, %v3169_v58  ;;  %v3172_v61 = vpop.f32.mrb[10].mxu0 }
 0x4dc   : > { %v3173_v63 = vpop.f32.mrb[11].mxu0 }
 0x4dd   : > { %v1683_v0 = vadd.f32 %v3171_v60, %v1594_v62  ;;  %v3174_v1 = vadd.f32 %v3173_v63, %v3172_v61  ;;  %v2132_v62 = vld [vmem:[%s4665_s9 + $0x8] sm:$0xff] }
 0x4df   : > { %v1732_v3 = vadd.f32 %v1731_v49, %v1683_v0  ;;  %v1686_v4 = vadd.f32 %v3174_v1, %v1599_v2  ;;  %v2134_v2 = vld [vmem:[%s4665_s9 + $0x18] sm:$0xff] }
 0x4e1   : > { %v1735_v5 = vadd.f32 %v1734_v51, %v1686_v4  ;;  %v3175_v6 = vpop.f32.mrb[12].mxu0  ;;  %v1746_v8 = vmax.f32 %v1732_v3, 0.0 }
 0x4e2   : > { %v3176_v7 = vpop.f32.mrb[13].mxu0 }
 0x4e3   : > { %v1747_v9 = vmax.f32 %v1735_v5, 0.0  ;;  %v3177_v10 = vadd.f32 %v3176_v7, %v3175_v6  ;;  %v3178_v11 = vpop.f32.mrb[14].mxu0 }
 0x4e4   : > { %v3179_v13 = vpop.f32.mrb[15].mxu0 }
 0x4e5   : > { %v1750_v15 = vpack.c.bf16 %v1747_v9, %v1746_v8  ;;  %v1691_v16 = vadd.f32 %v3177_v10, %v1604_v12  ;;  %v3180_v17 = vadd.f32 %v3179_v13, %v3178_v11  ;;  %v3683_v8 = vld [vmem:[%s4664_s8 + $0x4] ss:$12 sps:$4 sm:$0xff]   ;;  %v3684_v9 = vld [vmem:[%s4664_s8 + $0x8] ss:$12 sps:$4 sm:$0xff]   ;;  %v3685_v11 = vld [vmem:[%s4664_s8 + $0x20] ss:$12 sps:$4 sm:$0xff]  }
 0x4e6   : > { %v2131_v10 = vld [vmem:[%s4665_s9] sm:$0xff]  ;;  %v2133_v12 = vld [vmem:[%s4665_s9 + $0x10] sm:$0xff] }
 0x4e7   : > { %v1740_v20 = vadd.f32 %v3293_v47, %v1691_v16  ;;  %v1694_v21 = vadd.f32 %v3180_v17, %v1609_v19  ;;  %3063 = vmatmul.mubr.msk.bf16.vlgmr.msra.gmra.mrb[32].mxu1 %vm1335_vm2, %v1750_v15  ;;  %3303 = vmatprep.mubr.msk.bf16.mxu0 %vm1335_vm2, %v1750_v15  ;;  %v3689_v13 = vld [vmem:[%s4666_s10] ss:$20 sps:$4 sm:$0xff]  }
 0x4e8   : > { %1940 = vmatpush1.bf16.msra.mxu1 %v3667_v14  ;;  %1928 = vmatprep.mubr.bf16.mxu1 %v3790_v30  ;;  %v3691_v14 = vld [vmem:[%s4666_s10 + $0x4] ss:$20 sps:$4 sm:$0xff]  }
 0x4e9   : > { %v1743_v23 = vadd.f32 %v3294_v50, %v1694_v21  ;;  %1941 = vmatprep.subr.bf16.mxu1 %v3673_v18  ;;  %v1748_v26 = vmax.f32 %v1740_v20, 0.0 }
 0x4eb   : > { %v1749_v27 = vmax.f32 %v1743_v23, 0.0 }
 0x4ec   : > { %1942 = vmatpush1.bf16.msra.mxu1 %v3671_v22 }
 0x4ed   : > { %v1751_v32 = vpack.c.bf16 %v1749_v27, %v1748_v26  ;;  %1943 = vmatprep.subr.bf16.mxu1 %v3677_v25 }
 0x4ef   : > { %3064 = vmatmul.mubr.msk.bf16.gmra.mrb[36].mxu1 %vm1335_vm2, %v1751_v32  ;;  %3304 = vmatmul.mubr.msk.bf16.vlgmr.msra.gmra.mrb[16].mxu0 %vm1335_vm2, %v1751_v32 }
 0x4f0   : > { %1944 = vmatpush1.bf16.msra.mxu1 %v3675_v29  ;;  %1971 = vmatprep.mubr.bf16.mxu1 %v3790_v30 }
 0x4f1   : > { %1945 = vmatprep.subr.bf16.mxu1 %v3680_v34  ;;  %3311 = vmatprep.mubr.msk.bf16.mxu0 %vm1641_vm3, %v3684_v9 }
 0x4f4   : > { %1946 = vmatpush1.bf16.msra.mxu1 %v3678_v35 }
 0x4f7   : > { %3065 = vmatmul.mubr.msk.bf16.vlgmr.msra.gmra.mrb[40].mxu1 %vm1335_vm2, %v1750_v15 }
 0x4f8   : > { %1981 = vmatprep.mubr.bf16.mxu1 %v3790_v30 }
 0x4ff   : > { %3066 = vmatmul.mubr.msk.bf16.gmra.mrb[44].mxu1 %vm1335_vm2, %v1751_v32 }
 0x500   : > { %2223 = vmatprep.mubr.bf16.mxu1 %v3683_v8 }
 0x5ba   : > { %v1920_v36 = vpop.f32.mrb[32].mxu1 }
 0x5bb   : > { %v4400_v38 = vpop.f32.mrb[33].mxu1 }
 0x5bc   : > { %v1924_v40 = vpop.f32.mrb[34].mxu1 }
 0x5bd   : > { %v3421_v41 = vpack.i.bf16 %v1924_v40, %v1920_v36  ;;  %v2113_v42 = vpack.c.bf16 %v1924_v40, %v1920_v36  ;;  %v4402_v43 = vpop.f32.mrb[35].mxu1 }
 0x5be   : > { %v3446_v44 = vpack.i.bf16 %v4402_v43, %v4400_v38  ;;  %v2117_v24 = vpack.c.bf16 %v4402_v43, %v4400_v38  ;;  %v3681_v43 = vld [vmem:[%s4664_s8] ss:$12 sps:$4 sm:$0xff]  }
 0x5bf   : > { %3422 = vrot.lane.b32.xlu0 %v3421_v41, %s3789_s22 }
 0x5c2   : > { %v1930_v28 = vpop.f32.mrb[36].mxu1  ;;  %v3305_v31 = vpop.f32.mrb[16].mxu0 }
 0x5c3   : > { %v4409_v33 = vpop.f32.mrb[37].mxu1  ;;  %v2026_v37 = vpop.f32.mrb[17].mxu0 }
 0x5c4   : > { %v1934_v39 = vpop.f32.mrb[38].mxu1  ;;  %v3306_v45 = vpop.f32.mrb[18].mxu0 }
 0x5c5   : > { %v3436_v46 = vpack.i.bf16 %v1934_v39, %v1930_v28  ;;  %v2114_v47 = vpack.c.bf16 %v1934_v39, %v1930_v28  ;;  %v2130_v48 = vpack.c.bf16 %v3306_v45, %v3305_v31  ;;  %v4411_v49 = vpop.f32.mrb[39].mxu1  ;;  %v2029_v50 = vpop.f32.mrb[19].mxu0 }
 0x5c6   : > { %v3456_v51 = vpack.i.bf16 %v4411_v49, %v4409_v33  ;;  %v2118_v52 = vpack.c.bf16 %v4411_v49, %v4409_v33  ;;  %v2129_v53 = vpack.c.bf16 %v2029_v50, %v2026_v37  ;;  %v3688_v33 = vld [vmem:[%s4664_s8 + $0x18] ss:$12 sps:$4 sm:$0xff]   ;;  %v3694_v49 = vld [vmem:[%s4666_s10 + $0x2c] ss:$20 sps:$4 sm:$0xff]  }
 0x5c7   : > { %3437 = vrot.lane.b32.xlu0 %v3436_v46, %s3789_s22 }
 0x5c8   : > { %3307 = vmatprep.subr.bf16.mxu0 %v2129_v53 }
 0x5c9   : > { %3308 = vmatpush3.bf16.msra.mxu0 %v2129_v53  ;;  %v3692_v53 = vld [vmem:[%s4666_s10 + $0x28] ss:$20 sps:$4 sm:$0xff]  }
 0x5ca   : > { %v1973_v54 = vpop.f32.mrb[40].mxu1  ;;  %3309 = vmatprep.subr.bf16.mxu0 %v2130_v48 }
 0x5cb   : > { %3447 = vrot.lane.b32.xlu0 %v3446_v44, %s3789_s22  ;;  %v4419_v55 = vpop.f32.mrb[41].mxu1 }
 0x5cc   : > { %v1977_v56 = vpop.f32.mrb[42].mxu1 }
 0x5cd   : > { %v3426_v57 = vpack.i.bf16 %v1977_v56, %v1973_v54  ;;  %v2121_v58 = vpack.c.bf16 %v1977_v56, %v1973_v54  ;;  %v1979_v59 = vpop.f32.mrb[43].mxu1  ;;  %3310 = vmatpush3.bf16.msra.mxu0 %v2130_v48 }
 0x5ce   : > { %v3441_v60 = vpack.i.bf16 %v1979_v59, %v4419_v55  ;;  %v2125_v61 = vpack.c.bf16 %v1979_v59, %v4419_v55  ;;  %2429 = vmatprep.subr.bf16.mxu0 %v3691_v14  ;;  %v3695_v59 = vld [vmem:[%s4666_s10 + $0x50] ss:$20 sps:$4 sm:$0xff]  }
 0x5cf   : > { %3457 = vrot.lane.b32.xlu0 %v3456_v51, %s3789_s22  ;;  %3427 = vrot.lane.b32.xlu1 %v3426_v57, %s3789_s22  ;;  %v3697_v57 = vld [vmem:[%s4666_s10 + $0x54] ss:$20 sps:$4 sm:$0xff]  }
 0x5d0   : > { %3191 = vmatprep.subr.bf16.mxu1 %v2121_v58  ;;  %3312 = vmatmul.mubr.msk.bf16.vlgmr.msra.gmra.mrb[20].mxu0 %vm1641_vm3, %v3685_v11  ;;  %v3698_v58 = vld [vmem:[%s4666_s10 + $0x10] ss:$20 sps:$4 sm:$0xff]  }
 0x5d1   : > { %3192 = vmatpush3.bf16.msra.mxu1 %v2113_v42  ;;  %2461 = vmatprep.mubr.bf16.mxu0 %v3790_v30 }
 0x5d2   : > { %v1983_v63 = vpop.f32.mrb[44].mxu1  ;;  %2430 = vmatpush1.bf16.msra.mxu0 %v3689_v13 }
 0x5d3   : > { %2142 = vperm.xlu0 %3379, %v2132_v62   ;;  %v1985_v0 = vpop.f32.mrb[45].mxu1  ;;  %2431 = vmatprep.subr.bf16.mxu0 %v3694_v49  ;;  %v3699_v62 = vld [vmem:[%s4666_s10 + $0x78] ss:$20 sps:$4 sm:$0xff]  }
 0x5d4   : > { %v1987_v1 = vpop.f32.mrb[46].mxu1 }
 0x5d5   : > { %v3431_v3 = vpack.i.bf16 %v1987_v1, %v1983_v63  ;;  %v2122_v4 = vpack.c.bf16 %v1987_v1, %v1983_v63  ;;  %v1989_v5 = vpop.f32.mrb[47].mxu1  ;;  %v3705_v63 = vld [vmem:[%s4666_s10 + $0xc] ss:$20 sps:$4 sm:$0xff]   ;;  %v3710_v1 = vld [vmem:[%s4666_s10 + $0x88] ss:$20 sps:$4 sm:$0xff]  }
 0x5d6   : > { %v3451_v6 = vpack.i.bf16 %v1989_v5, %v1985_v0  ;;  %v2126_v7 = vpack.c.bf16 %v1989_v5, %v1985_v0  ;;  %2432 = vmatpush1.bf16.msra.mxu0 %v3692_v53  ;;  %v3706_v0 = vld [vmem:[%s4666_s10 + $0x60] ss:$20 sps:$4 sm:$0xff]  }
 0x5d7   : > { %2152 = vperm.xlu0 %3379, %v2134_v2   ;;  %3432 = vrot.lane.b32.xlu1 %v3431_v3, %s3789_s22 }
 0x5d8   : > { %3193 = vmatprep.subr.bf16.mxu1 %v2122_v4  ;;  %2433 = vmatprep.subr.bf16.mxu0 %v3697_v57 }
 0x5d9   : > { %3194 = vmatpush3.bf16.msra.mxu1 %v2114_v47 }
 0x5da   : > { %2434 = vmatpush1.bf16.msra.mxu0 %v3695_v59 }
 0x5db   : > { %3442 = vrot.lane.b32.xlu1 %v3441_v60, %s3789_s22  ;;  %v3701_v60 = vld [vmem:[%s4666_s10 + $0x7c] ss:$20 sps:$4 sm:$0xff]  }
 0x5dc   : > { %2435 = vmatprep.subr.bf16.mxu0 %v3701_v60 }
 0x5de   : > { %2436 = vmatpush1.bf16.msra.mxu0 %v3699_v62 }
 0x5df   : > { %3452 = vrot.lane.b32.xlu1 %v3451_v6, %s3789_s22  ;;  %2482 = vmatprep.subr.bf16.mxu0 %v3705_v63 }
 0x5e3   : > { %2137 = vperm.xlu1 %3380, %v2131_v10  }
 0x5e7   : > { %2147 = vperm.xlu1 %3380, %v2133_v12  }
 0x631   : > { %v3423_v15 = vpop.permute.xlu0 %3422 }
 0x632   : > { %v3425_v16 = vunpack.i.h.bf16 %v3423_v15  ;;  %v3424_v17 = vunpack.i.l.bf16 %v3423_v15 }
 0x634   : > { %v2115_v22 = vpack.c.bf16 %v3425_v16, %v3424_v17 }
 0x639   : > { %v3438_v23 = vpop.permute.xlu0 %3437 }
 0x63a   : > { %v3440_v25 = vunpack.i.h.bf16 %v3438_v23  ;;  %v3439_v26 = vunpack.i.l.bf16 %v3438_v23 }
 0x63c   : > { %v2116_v35 = vpack.c.bf16 %v3440_v25, %v3439_v26 }
 0x63d   : > { %v3448_v40 = vpop.permute.xlu0 %3447 }
 0x63e   : > { %v3450_v28 = vunpack.i.h.bf16 %v3448_v40  ;;  %v3449_v31 = vunpack.i.l.bf16 %v3448_v40  ;;  %v3713_v40 = vld [vmem:[%s4666_s10 + $0x5c] ss:$20 sps:$4 sm:$0xff]  }
 0x640   : > { %v2119_v47 = vpack.c.bf16 %v3450_v28, %v3449_v31  ;;  %v3716_v31 = vld [vmem:[%s4666_s10 + $0x84] ss:$20 sps:$4 sm:$0xff]  }
 0x641   : > { %v3428_v18 = vpop.permute.xlu1 %3427  ;;  %v3458_v37 = vpop.permute.xlu0 %3457 }
 0x642   : > { %v3430_v19 = vunpack.i.h.bf16 %v3428_v18  ;;  %v3429_v20 = vunpack.i.l.bf16 %v3428_v18  ;;  %v3460_v48 = vunpack.i.h.bf16 %v3458_v37  ;;  %v3459_v50 = vunpack.i.l.bf16 %v3458_v37  ;;  %v3714_v37 = vld [vmem:[%s4666_s10 + $0x80] ss:$20 sps:$4 sm:$0xff]  }
 0x644   : > { %v2123_v21 = vpack.c.bf16 %v3430_v19, %v3429_v20  ;;  %v2120_v38 = vpack.c.bf16 %v3460_v48, %v3459_v50 }
 0x646   : > { %3195 = vmatprep.subr.bf16.mxu1 %v2123_v21 }
 0x647   : > { %3196 = vmatpush3.bf16.msra.mxu1 %v2115_v22  ;;  %v3703_v22 = vld [vmem:[%s4666_s10 + $0x8] ss:$20 sps:$4 sm:$0xff]  }
 0x649   : > { %v3433_v27 = vpop.permute.xlu1 %3432 }
 0x64a   : > { %v3435_v29 = vunpack.i.h.bf16 %v3433_v27  ;;  %v3434_v32 = vunpack.i.l.bf16 %v3433_v27  ;;  %v3709_v27 = vld [vmem:[%s4666_s10 + $0x34] ss:$20 sps:$4 sm:$0xff]  }
 0x64c   : > { %v2124_v34 = vpack.c.bf16 %v3435_v29, %v3434_v32 }
 0x64d   : > { %v3443_v36 = vpop.permute.xlu1 %3442 }
 0x64e   : > { %3197 = vmatprep.subr.bf16.mxu1 %v2124_v34  ;;  %v3445_v41 = vunpack.i.h.bf16 %v3443_v36  ;;  %v3444_v42 = vunpack.i.l.bf16 %v3443_v36 }
 0x64f   : > { %3198 = vmatpush3.bf16.msra.mxu1 %v2116_v35  ;;  %v3707_v35 = vld [vmem:[%s4666_s10 + $0x30] ss:$20 sps:$4 sm:$0xff]  }
 0x650   : > { %3199 = vmatprep.subr.bf16.mxu1 %v2125_v61  ;;  %v2127_v39 = vpack.c.bf16 %v3445_v41, %v3444_v42  ;;  %v3702_v61 = vld [vmem:[%s4666_s10 + $0x38] ss:$20 sps:$4 sm:$0xff]  }
 0x651   : > { %v3453_v44 = vpop.permute.xlu1 %3452 }
 0x652   : > { %v3455_v45 = vunpack.i.h.bf16 %v3453_v44  ;;  %v3454_v46 = vunpack.i.l.bf16 %v3453_v44  ;;  %v2143_v10 = vpop.permute.xlu0 %2142  ;;  %v3711_v44 = vld [vmem:[%s4666_s10 + $0x58] ss:$20 sps:$4 sm:$0xff]  }
 0x653   : > { %3200 = vmatpush3.bf16.msra.mxu1 %v2117_v24  ;;  %v3686_v24 = vld [vmem:[%s4664_s8 + $0x1c] ss:$12 sps:$4 sm:$0xff]  }
 0x654   : > { %3201 = vmatprep.subr.bf16.mxu1 %v2126_v7  ;;  %v2128_v51 = vpack.c.bf16 %v3455_v45, %v3454_v46 }
 0x656   : > { %v2153_v29 = vpop.permute.xlu0 %2152 }
 0x657   : > { %3202 = vmatpush3.bf16.msra.mxu1 %v2118_v52 }
 0x658   : > { %3203 = vmatprep.subr.bf16.mxu1 %v2127_v39 }
 0x65b   : > { %3204 = vmatpush3.bf16.msra.mxu1 %v2119_v47 }
 0x65c   : > { %3205 = vmatprep.subr.bf16.mxu1 %v2128_v51 }
 0x65f   : > { %3206 = vmatpush3.bf16.msra.mxu1 %v2120_v38 }
 0x660   : > { %3315 = vmatprep.subr.bf16.mxu1 %v3698_v58 }
 0x662   : > { %2224 = vmatmul.mubr.bf16.vlgmr.msra.gmra.mrb[48].mxu1 %v3681_v43  ;;  %v2138_v6 = vpop.permute.xlu1 %2137 }
 0x663   : > { %2231 = vmatprep.mubr.bf16.mxu1 %v3686_v24  ;;  %3316 = vmatpush3.bf16.msra.mxu1 %v3698_v58 }
 0x664   : > { %3317 = vmatprep.subr.bf16.mxu1 %v3702_v61 }
 0x666   : > { %v2148_v20 = vpop.permute.xlu1 %2147 }
 0x667   : > { %3318 = vmatpush3.bf16.msra.mxu1 %v3702_v61 }
 0x668   : > { %3319 = vmatprep.subr.bf16.mxu1 %v3706_v0 }
 0x66a   : > { %2232 = vmatmul.mubr.bf16.gmra.mrb[52].mxu1 %v3688_v33 }
 0x66b   : > { %3320 = vmatpush3.bf16.msra.mxu1 %v3706_v0 }
 0x66c   : > { %3321 = vmatprep.subr.bf16.mxu1 %v3710_v1 }
 0x66f   : > { %3322 = vmatpush3.bf16.msra.mxu1 %v3710_v1 }
 0x6a3   : > { %v3313_v52 = vpop.f32.mrb[20].mxu0 }
 0x6a4   : > { %v2274_v54 = vpop.f32.mrb[21].mxu0 }
 0x6a5   : > { %v3314_v55 = vpop.f32.mrb[22].mxu0 }
 0x6a6   : > { %v2277_v56 = vpop.f32.mrb[23].mxu0 }
 0x735   : > { %v3207_v2 = vpop.f32.mrb[48].mxu1 }
 0x736   : > { %v3208_v3 = vpop.f32.mrb[49].mxu1 }
 0x737   : > { %v3209_v4 = vadd.f32 %v3208_v3, %v3207_v2  ;;  %v3210_v5 = vpop.f32.mrb[50].mxu1 }
 0x738   : > { %v3211_v7 = vpop.f32.mrb[51].mxu1 }
 0x739   : > { %v2226_v8 = vadd.f32 %v3209_v4, %v2138_v6  ;;  %v3212_v9 = vadd.f32 %v3211_v7, %v3210_v5  ;;  %v2675_v5 = vld [vmem:[%s4668_s12 + $0x8] sm:$0xff] }
 0x73b   : > { %v2275_v11 = vadd.f32 %v2274_v54, %v2226_v8  ;;  %v2229_v12 = vadd.f32 %v3212_v9, %v2143_v10  ;;  %v2677_v9 = vld [vmem:[%s4668_s12 + $0x18] sm:$0xff] }
 0x73d   : > { %v2278_v13 = vadd.f32 %v2277_v56, %v2229_v12  ;;  %v3213_v14 = vpop.f32.mrb[52].mxu1  ;;  %v2289_v16 = vmax.f32 %v2275_v11, 0.0 }
 0x73e   : > { %v3214_v15 = vpop.f32.mrb[53].mxu1 }
 0x73f   : > { %v2290_v17 = vmax.f32 %v2278_v13, 0.0  ;;  %v3215_v18 = vadd.f32 %v3214_v15, %v3213_v14  ;;  %v3216_v19 = vpop.f32.mrb[54].mxu1  ;;  %v3719_v15 = vld [vmem:[%s4667_s11 + $0x4] ss:$12 sps:$4 sm:$0xff]  }
 0x740   : > { %v3217_v21 = vpop.f32.mrb[55].mxu1 }
 0x741   : > { %v2293_v23 = vpack.c.bf16 %v2290_v17, %v2289_v16  ;;  %v2234_v25 = vadd.f32 %v3215_v18, %v2148_v20  ;;  %v3218_v26 = vadd.f32 %v3217_v21, %v3216_v19  ;;  %v2674_v16 = vld [vmem:[%s4668_s12] sm:$0xff]  ;;  %v3720_v17 = vld [vmem:[%s4667_s11 + $0x8] ss:$12 sps:$4 sm:$0xff]  }
 0x742   : > { %v3721_v18 = vld [vmem:[%s4667_s11 + $0x20] ss:$12 sps:$4 sm:$0xff]   ;;  %v2676_v19 = vld [vmem:[%s4668_s12 + $0x10] sm:$0xff] }
 0x743   : > { %v2283_v32 = vadd.f32 %v3313_v52, %v2234_v25  ;;  %v2237_v34 = vadd.f32 %v3218_v26, %v2153_v29  ;;  %3097 = vmatmul.mubr.msk.bf16.vlgmr.msra.gmra.mrb[24].mxu0 %vm1335_vm2, %v2293_v23  ;;  %3323 = vmatprep.mubr.msk.bf16.mxu1 %vm1335_vm2, %v2293_v23 }
 0x744   : > { %2483 = vmatpush1.bf16.msra.mxu0 %v3703_v22  ;;  %2471 = vmatprep.mubr.bf16.mxu0 %v3790_v30 }
 0x745   : > { %v2286_v36 = vadd.f32 %v3314_v55, %v2237_v34  ;;  %2484 = vmatprep.subr.bf16.mxu0 %v3709_v27  ;;  %v2291_v41 = vmax.f32 %v2283_v32, 0.0 }
 0x747   : > { %v2292_v42 = vmax.f32 %v2286_v36, 0.0 }
 0x748   : > { %2485 = vmatpush1.bf16.msra.mxu0 %v3707_v35 }
 0x749   : > { %v2294_v28 = vpack.c.bf16 %v2292_v42, %v2291_v41  ;;  %2486 = vmatprep.subr.bf16.mxu0 %v3713_v40 }
 0x74b   : > { %3098 = vmatmul.mubr.msk.bf16.gmra.mrb[28].mxu0 %vm1335_vm2, %v2294_v28  ;;  %3324 = vmatmul.mubr.msk.bf16.vlgmr.msra.gmra.mrb[56].mxu1 %vm1335_vm2, %v2294_v28 }
 0x74c   : > { %2487 = vmatpush1.bf16.msra.mxu0 %v3711_v44  ;;  %2514 = vmatprep.mubr.bf16.mxu0 %v3790_v30 }
 0x74d   : > { %2488 = vmatprep.subr.bf16.mxu0 %v3716_v31  ;;  %3331 = vmatprep.mubr.msk.bf16.mxu1 %vm1641_vm3, %v3720_v17 }
 0x750   : > { %2489 = vmatpush1.bf16.msra.mxu0 %v3714_v37 }
 0x753   : > { %3099 = vmatmul.mubr.msk.bf16.vlgmr.msra.gmra.mrb[32].mxu0 %vm1335_vm2, %v2293_v23 }
 0x754   : > { %2524 = vmatprep.mubr.bf16.mxu0 %v3790_v30 }
 0x75b   : > { %3100 = vmatmul.mubr.msk.bf16.gmra.mrb[36].mxu0 %vm1335_vm2, %v2294_v28 }
 0x75c   : > { %2766 = vmatprep.mubr.bf16.mxu0 %v3719_v15 }
 0x816   : > { %v2463_v39 = vpop.f32.mrb[24].mxu0 }
 0x817   : > { %v4536_v45 = vpop.f32.mrb[25].mxu0 }
 0x818   : > { %v2467_v46 = vpop.f32.mrb[26].mxu0 }
 0x819   : > { %v3461_v47 = vpack.i.bf16 %v2467_v46, %v2463_v39  ;;  %v2656_v48 = vpack.c.bf16 %v2467_v46, %v2463_v39  ;;  %v4538_v50 = vpop.f32.mrb[27].mxu0 }
 0x81a   : > { %v3486_v51 = vpack.i.bf16 %v4538_v50, %v4536_v45  ;;  %v2660_v38 = vpack.c.bf16 %v4538_v50, %v4536_v45  ;;  %v3717_v50 = vld [vmem:[%s4667_s11] ss:$12 sps:$4 sm:$0xff]  }
 0x81b   : > { %3462 = vrot.lane.b32.xlu0 %v3461_v47, %s3789_s22 }
 0x81e   : > { %v2473_v43 = vpop.f32.mrb[28].mxu0  ;;  %v3325_v30 = vpop.f32.mrb[56].mxu1 }
 0x81f   : > { %v4545_v24 = vpop.f32.mrb[29].mxu0  ;;  %v2569_v33 = vpop.f32.mrb[57].mxu1 }
 0x820   : > { %v2477_v49 = vpop.f32.mrb[30].mxu0  ;;  %v3326_v52 = vpop.f32.mrb[58].mxu1 }
 0x821   : > { %v3476_v53 = vpack.i.bf16 %v2477_v49, %v2473_v43  ;;  %v2657_v54 = vpack.c.bf16 %v2477_v49, %v2473_v43  ;;  %v2673_v55 = vpack.c.bf16 %v3326_v52, %v3325_v30  ;;  %v4547_v56 = vpop.f32.mrb[31].mxu0  ;;  %v2572_v57 = vpop.f32.mrb[59].mxu1 }
 0x822   : > { %v3496_v58 = vpack.i.bf16 %v4547_v56, %v4545_v24  ;;  %v2661_v59 = vpack.c.bf16 %v4547_v56, %v4545_v24  ;;  %v2672_v60 = vpack.c.bf16 %v2572_v57, %v2569_v33  ;;  %v3724_v24 = vld [vmem:[%s4667_s11 + $0x18] ss:$12 sps:$4 sm:$0xff]  }
 0x823   : > { %3477 = vrot.lane.b32.xlu0 %v3476_v53, %s3789_s22 }
 0x824   : > { %3327 = vmatprep.subr.bf16.mxu1 %v2672_v60 }
 0x825   : > { %3328 = vmatpush3.bf16.msra.mxu1 %v2672_v60 }
 0x826   : > { %v2516_v61 = vpop.f32.mrb[32].mxu0  ;;  %3329 = vmatprep.subr.bf16.mxu1 %v2673_v55 }
 0x827   : > { %3487 = vrot.lane.b32.xlu0 %v3486_v51, %s3789_s22  ;;  %v2518_v62 = vpop.f32.mrb[33].mxu0 }
 0x828   : > { %v2520_v63 = vpop.f32.mrb[34].mxu0 }
 0x829   : > { %v3466_v0 = vpack.i.bf16 %v2520_v63, %v2516_v61  ;;  %v2664_v1 = vpack.c.bf16 %v2520_v63, %v2516_v61  ;;  %v2522_v2 = vpop.f32.mrb[35].mxu0  ;;  %3330 = vmatpush3.bf16.msra.mxu1 %v2673_v55 }
 0x82a   : > { %v3481_v3 = vpack.i.bf16 %v2522_v2, %v2518_v62  ;;  %v2668_v4 = vpack.c.bf16 %v2522_v2, %v2518_v62 }
 0x82b   : > { %3497 = vrot.lane.b32.xlu0 %v3496_v58, %s3789_s22  ;;  %3467 = vrot.lane.b32.xlu1 %v3466_v0, %s3789_s22 }
 0x82c   : > { %3229 = vmatprep.subr.bf16.mxu0 %v2664_v1  ;;  %3332 = vmatmul.mubr.msk.bf16.vlgmr.msra.gmra.mrb[60].mxu1 %vm1641_vm3, %v3721_v18 }
 0x82d   : > { %3230 = vmatpush3.bf16.msra.mxu0 %v2656_v48 }
 0x82e   : > { %v2526_v6 = vpop.f32.mrb[36].mxu0 }
 0x82f   : > { %2685 = vperm.xlu0 %3379, %v2675_v5   ;;  %v2528_v7 = vpop.f32.mrb[37].mxu0 }
 0x830   : > { %v2530_v8 = vpop.f32.mrb[38].mxu0 }
 0x831   : > { %v3471_v10 = vpack.i.bf16 %v2530_v8, %v2526_v6  ;;  %v2665_v11 = vpack.c.bf16 %v2530_v8, %v2526_v6  ;;  %v2532_v12 = vpop.f32.mrb[39].mxu0 }
 0x832   : > { %v3491_v13 = vpack.i.bf16 %v2532_v12, %v2528_v7  ;;  %v2669_v14 = vpack.c.bf16 %v2532_v12, %v2528_v7 }
 0x833   : > { %2695 = vperm.xlu0 %3379, %v2677_v9   ;;  %3472 = vrot.lane.b32.xlu1 %v3471_v10, %s3789_s22 }
 0x834   : > { %3231 = vmatprep.subr.bf16.mxu0 %v2665_v11 }
 0x835   : > { %3232 = vmatpush3.bf16.msra.mxu0 %v2657_v54 }
 0x837   : > { %3482 = vrot.lane.b32.xlu1 %v3481_v3, %s3789_s22 }
 0x83b   : > { %3492 = vrot.lane.b32.xlu1 %v3491_v13, %s3789_s22 }
 0x83f   : > { %2680 = vperm.xlu1 %3380, %v2674_v16  }
 0x843   : > { %2690 = vperm.xlu1 %3380, %v2676_v19  }
 0x88d   : > { %v3463_v20 = vpop.permute.xlu0 %3462 }
 0x88e   : > { %v3465_v21 = vunpack.i.h.bf16 %v3463_v20  ;;  %v3464_v22 = vunpack.i.l.bf16 %v3463_v20 }
 0x890   : > { %v2658_v29 = vpack.c.bf16 %v3465_v21, %v3464_v22 }
 0x895   : > { %v3478_v32 = vpop.permute.xlu0 %3477 }
 0x896   : > { %v3480_v34 = vunpack.i.h.bf16 %v3478_v32  ;;  %v3479_v35 = vunpack.i.l.bf16 %v3478_v32 }
 0x898   : > { %v2659_v44 = vpack.c.bf16 %v3480_v34, %v3479_v35 }
 0x899   : > { %v3488_v31 = vpop.permute.xlu0 %3487 }
 0x89a   : > { %v3490_v47 = vunpack.i.h.bf16 %v3488_v31  ;;  %v3489_v48 = vunpack.i.l.bf16 %v3488_v31 }
 0x89c   : > { %v2662_v49 = vpack.c.bf16 %v3490_v47, %v3489_v48 }
 0x89d   : > { %v3468_v23 = vpop.permute.xlu1 %3467  ;;  %v3498_v51 = vpop.permute.xlu0 %3497 }
 0x89e   : > { %v3470_v25 = vunpack.i.h.bf16 %v3468_v23  ;;  %v3469_v26 = vunpack.i.l.bf16 %v3468_v23  ;;  %v3500_v52 = vunpack.i.h.bf16 %v3498_v51  ;;  %v3499_v53 = vunpack.i.l.bf16 %v3498_v51 }
 0x8a0   : > { %v2666_v27 = vpack.c.bf16 %v3470_v25, %v3469_v26  ;;  %v2663_v45 = vpack.c.bf16 %v3500_v52, %v3499_v53 }
 0x8a2   : > { %3233 = vmatprep.subr.bf16.mxu0 %v2666_v27 }
 0x8a3   : > { %3234 = vmatpush3.bf16.msra.mxu0 %v2658_v29 }
 0x8a5   : > { %v3473_v36 = vpop.permute.xlu1 %3472 }
 0x8a6   : > { %v3475_v40 = vunpack.i.h.bf16 %v3473_v36  ;;  %v3474_v41 = vunpack.i.l.bf16 %v3473_v36 }
 0x8a8   : > { %v2667_v42 = vpack.c.bf16 %v3475_v40, %v3474_v41 }
 0x8a9   : > { %v3483_v28 = vpop.permute.xlu1 %3482 }
 0x8aa   : > { %3235 = vmatprep.subr.bf16.mxu0 %v2667_v42  ;;  %v3485_v37 = vunpack.i.h.bf16 %v3483_v28  ;;  %v3484_v39 = vunpack.i.l.bf16 %v3483_v28 }
 0x8ab   : > { %3236 = vmatpush3.bf16.msra.mxu0 %v2659_v44 }
 0x8ac   : > { %3237 = vmatprep.subr.bf16.mxu0 %v2668_v4  ;;  %v2670_v43 = vpack.c.bf16 %v3485_v37, %v3484_v39 }
 0x8ad   : > { %v3493_v46 = vpop.permute.xlu1 %3492 }
 0x8ae   : > { %v3495_v30 = vunpack.i.h.bf16 %v3493_v46  ;;  %v3494_v33 = vunpack.i.l.bf16 %v3493_v46  ;;  %v2686_v3 = vpop.permute.xlu0 %2685 }
 0x8af   : > { %3238 = vmatpush3.bf16.msra.mxu0 %v2660_v38  ;;  %v3722_v38 = vld [vmem:[%s4667_s11 + $0x1c] ss:$12 sps:$4 sm:$0xff]  }
 0x8b0   : > { %3239 = vmatprep.subr.bf16.mxu0 %v2669_v14  ;;  %v2671_v54 = vpack.c.bf16 %v3495_v30, %v3494_v33 }
 0x8b2   : > { %v2696_v17 = vpop.permute.xlu0 %2695 }
 0x8b3   : > { %3240 = vmatpush3.bf16.msra.mxu0 %v2661_v59 }
 0x8b4   : > { %3241 = vmatprep.subr.bf16.mxu0 %v2670_v43 }
 0x8b7   : > { %3242 = vmatpush3.bf16.msra.mxu0 %v2662_v49 }
 0x8b8   : > { %3243 = vmatprep.subr.bf16.mxu0 %v2671_v54 }
 0x8bb   : > { %3244 = vmatpush3.bf16.msra.mxu0 %v2663_v45 }
 0x8be   : > { %2767 = vmatmul.mubr.bf16.vlgmr.msra.gmra.mrb[40].mxu0 %v3717_v50  ;;  %v2681_v63 = vpop.permute.xlu1 %2680 }
 0x8bf   : > { %2774 = vmatprep.mubr.bf16.mxu0 %v3722_v38 }
 0x8c2   : > { %v2691_v13 = vpop.permute.xlu1 %2690 }
 0x8c6   : > { %2775 = vmatmul.mubr.bf16.gmra.mrb[44].mxu0 %v3724_v24 }
 0x8ff   : > { %v3333_v55 = vpop.f32.mrb[60].mxu1 }
 0x900   : > { %v2817_v56 = vpop.f32.mrb[61].mxu1 }
 0x901   : > { %v3334_v57 = vpop.f32.mrb[62].mxu1 }
 0x902   : > { %v2820_v58 = vpop.f32.mrb[63].mxu1 }
 0x991   : > { %v3245_v59 = vpop.f32.mrb[40].mxu0 }
 0x992   : > { %v3246_v60 = vpop.f32.mrb[41].mxu0 }
 0x993   : > { %v3247_v61 = vadd.f32 %v3246_v60, %v3245_v59  ;;  %v3248_v62 = vpop.f32.mrb[42].mxu0 }
 0x994   : > { %v3249_v0 = vpop.f32.mrb[43].mxu0 }
 0x995   : > { %v3250_v1 = vadd.f32 %v3249_v0, %v3248_v62  ;;  %v2769_v2 = vadd.f32 %v3247_v61, %v2681_v63 }
 0x997   : > { %v2818_v4 = vadd.f32 %v2817_v56, %v2769_v2  ;;  %v2772_v5 = vadd.f32 %v3250_v1, %v2686_v3 }
 0x999   : > { %v2832_v6 = vmax.f32 %v2818_v4, 0.0  ;;  %v2821_v7 = vadd.f32 %v2820_v58, %v2772_v5  ;;  %v3251_v8 = vpop.f32.mrb[44].mxu0 }
 0x99a   : > { %v3252_v9 = vpop.f32.mrb[45].mxu0 }
 0x99b   : > { %2836 = vst.msk [vmem:[%s433_s27] sm:$0xff] %vm1335_vm2, %v2832_v6  ;;  %v2833_v10 = vmax.f32 %v2821_v7, 0.0  ;;  %v3253_v11 = vadd.f32 %v3252_v9, %v3251_v8  ;;  %v3254_v12 = vpop.f32.mrb[46].mxu0 }
 0x99c   : > { %v3255_v14 = vpop.f32.mrb[47].mxu0 }
 0x99d   : > { %2837 = vst.msk [vmem:[%s433_s27 + $0x8] sm:$0xff] %vm1335_vm2, %v2833_v10  ;;  %v2777_v15 = vadd.f32 %v3253_v11, %v2691_v13  ;;  %v3256_v16 = vadd.f32 %v3255_v14, %v3254_v12 }
 0x99f   : > { %v2826_v18 = vadd.f32 %v3333_v55, %v2777_v15  ;;  %v2780_v19 = vadd.f32 %v3256_v16, %v2696_v17 }
 0x9a1   : > { %v2834_v20 = vmax.f32 %v2826_v18, 0.0  ;;  %v2829_v21 = vadd.f32 %v3334_v57, %v2780_v19 }
 0x9a3   : > { %2838 = vst.msk [vmem:[%s433_s27 + $0x10] sm:$0xff] %vm1335_vm2, %v2834_v20  ;;  %v2835_v22 = vmax.f32 %v2829_v21, 0.0 }
 0x9a5   : > { %2839 = vst.msk [vmem:[%s433_s27 + $0x18] sm:$0xff] %vm1335_vm2, %v2835_v22 }
 0x9a6   : > { %3738 = shalt.err (!%p3735_p3)
}
 0x9a7   : > { %s3739_s16 = scalar_lea.hbm %s4610_s24, 512  ;;  %s3743_s17 = scalar_lea.hbm %s4669_s13, 1024 }
 0x9a8   : > { %p3740_p4 = scmp.ne.s32.totalorder %s4610_s24, %s3739_s16  ;;  %p3744_p9 = scmp.lt.u32.totalorder %s4610_s24, %s4669_s13 }
 0x9a9   : > { %p3745_p10 = scmp.lt.u32.totalorder %s3743_s17, %s3739_s16  ;;  %p3747_p12 = scmp.lt.u32.totalorder %s3739_s16, %s4610_s24 }
 0x9aa   : > { %p3741_p7 = pnand %p3740_p4, %p3902_p5 }
 0x9ab   : > { %p3746_p11 = por %p3745_p10, %p3744_p9 }
 0x9ac   : > { %p3742_p8 = pneg %p3741_p7 }
 0x9ad   : > { %p3748_p13 = por %p3747_p12, %p3746_p11 }
 0x9af   : > { %p3749_p0 = pnand %p3748_p13, %p3742_p8 }
 0x9b1   : > { %3752 = shalt.err (!%p3749_p0)
}
 0x9b2   : > { %s3792_s29 = smov 128   ;;  %s3793_s21 = smov 8  }
 0x9b3   : > { %3336 = dma.vmem_to_hbm [thread:$0]  (%p3902_p5), %s4604_s23, 512, %s4610_s24, %s4615_s14, %s3792_s29, %s3792_s29, %s3793_s21  }
 0x9b4 PF: > { %p3342_p1 = scmp.ge.s32.totalorder %s3787_s28, 2  ;;  %s2869_s15 = sand.u32 1, %s3775_s25  }
 0x9b5   : > { %s2870_s16 = scalar_lea.sflag [#allocation3], %s2869_s15 }
 0x9b6   : > { %p3339_p2 = pnand %p3342_p1, %p3906_p6 }
 0x9b8   : > { %3770 = dma.done.wait (!%p3339_p2), %s2870_s16, 512  }
 0x9b9   : > { %3772 = vsyncadd (!%p3339_p2), %s2870_s16, 4294966784  ;;  %s4681_s28 = sld [smem:[#allocation6_spill]]  ;;  %s4682_s19 = sld [smem:[#allocation5_spill]] }
 0x9ba   : > { %s4683_s27 = sld [smem:[#allocation7_spill]]  ;;  %s4684_s25 = smov %s3779_s26 }
 0x9bf   : > { %p23_p3 = scmp.ge.s32.totalorder %s4681_s28, 4   ;;  %s4685_s26 = smov %s4682_s19 }
 0x9c1   :  { %25 = sbr.rel (!%p23_p3) target bundleno = 3 (0x3), region = 107 }
 0x9c8   :  { %2875 = vsyncpa [#allocation3], 1 }
 0x9c9   :  { %2877 = vsyncpa [#allocation3 + $0x1], 1 }

</bundles_post_ra>
